<compile_context>
chip_gen: v7x
topology: tpu7x:2x2x1
jax: 0.10.0
libtpu: 0.0.40
codegen_flags: <defaults>
</compile_context>

<pallas_src>
import functools
import math

import jax
import jax.numpy as jnp
from jax.experimental import pallas as pl
from jax.experimental.pallas import tpu as pltpu


def _layernorm(x, eps=1e-5):
    mu = jnp.mean(x, axis=-1, keepdims=True)
    var = jnp.mean((x - mu) ** 2, axis=-1, keepdims=True)
    return (x - mu) * jax.lax.rsqrt(var + eps)


def decoder_kernel(dec_ref, enc_ref, wq_ref, wk_ref, wv_ref, wo_ref,
                   w1_ref, w2_ref, out_ref, act_ref,
                   *, n_heads, d_k, d_v, batch, tgt_len, src_len):
    """One grid step == one decoder layer (grid=(n_layers,), 'arbitrary').

    dec_ref: (B*T, D)   enc_ref: (B*S, D)      -- constant block index, DMA'd once
    wq/wk/wv_ref: (H, D, d_k|d_v)  wo_ref: (H, d_v, D)   -- per-layer blocks
    w1_ref: (D, d_ff)   w2_ref: (d_ff, D)
    act_ref: VMEM scratch (B*T, D) f32 carrying the activation across layers.
    """
    layer = pl.program_id(0)

    @pl.when(layer == 0)
    def _():
        # f32 inputs -> this cast is a no-op; kept for dtype generality.
        act_ref[...] = dec_ref[...].astype(jnp.float32)

    x = act_ref[...]                              # (B*T, D) f32
    e = enc_ref[...].astype(jnp.float32)          # (B*S, D) f32

    scale = jnp.float32(1.0 / math.sqrt(d_k))

    # ---- cross multi-head attention ----------------------------------------
    attn_out = jnp.zeros_like(x)                  # (B*T, D)
    for h in range(n_heads):                      # static unroll, leading-dim indexing only
        wq_h = wq_ref[h]                          # (D, d_k)
        wk_h = wk_ref[h]                          # (D, d_k)
        wv_h = wv_ref[h]                          # (D, d_v)
        wo_h = wo_ref[h]                          # (d_v, D)

        Qh = jnp.dot(x, wq_h, preferred_element_type=jnp.float32)   # (B*T, d_k)
        Kh = jnp.dot(e, wk_h, preferred_element_type=jnp.float32)   # (B*S, d_k)
        Vh = jnp.dot(e, wv_h, preferred_element_type=jnp.float32)   # (B*S, d_v)

        ctx_rows = []
        for b in range(batch):                    # static unroll, sublane-aligned row slices
            q = Qh[b * tgt_len:(b + 1) * tgt_len, :]                 # (T, d_k)
            k = Kh[b * src_len:(b + 1) * src_len, :]                 # (S, d_k)
            v = Vh[b * src_len:(b + 1) * src_len, :]                 # (S, d_v)
            s = jnp.dot(q, k.T, preferred_element_type=jnp.float32) * scale   # (T, S)
            s = s - jnp.max(s, axis=-1, keepdims=True)
            p = jnp.exp(s)
            p = p * pl.reciprocal(jnp.sum(p, axis=-1, keepdims=True), approx=True)
            ctx_rows.append(jnp.dot(p, v, preferred_element_type=jnp.float32))  # (T, d_v)
        ctx_h = jnp.concatenate(ctx_rows, axis=0)                    # (B*T, d_v)

        # Output projection of the "concatenated heads": sum over per-head W_O blocks.
        attn_out = attn_out + jnp.dot(ctx_h, wo_h,
                                      preferred_element_type=jnp.float32)

    # Residual + LayerNorm (post cross-attention).
    a = _layernorm(attn_out + x)

    # ---- position-wise FFN: Linear -> ReLU -> Linear, residual, LayerNorm ---
    h1 = jnp.dot(a, w1_ref[...], preferred_element_type=jnp.float32)
    h1 = jnp.maximum(h1, 0.0)
    ffn = jnp.dot(h1, w2_ref[...], preferred_element_type=jnp.float32)
    y = _layernorm(ffn + a)

    act_ref[...] = y                              # carry to next layer (VMEM-resident)
    out_ref[...] = y.astype(out_ref.dtype)        # out block is resident; HBM writeback once


def decoder_forward(dec_inputs, enc_outputs, layer_params, *, n_heads, d_k, d_v):
    """layer_params: list of (wq_t, wk_t, wv_t, wo_t, w1_t, w2_t), each [in, out]."""
    B, T, D = dec_inputs.shape
    _, S, _ = enc_outputs.shape
    L = len(layer_params)
    d_ff = layer_params[0][4].shape[1]

    # Re-pack weights: per-head blocks stacked on leading axes -> (L, H, D, d_k) etc.
    wq = jnp.stack([p[0].reshape(D, n_heads, d_k).transpose(1, 0, 2) for p in layer_params])
    wk = jnp.stack([p[1].reshape(D, n_heads, d_k).transpose(1, 0, 2) for p in layer_params])
    wv = jnp.stack([p[2].reshape(D, n_heads, d_v).transpose(1, 0, 2) for p in layer_params])
    wo = jnp.stack([p[3].reshape(n_heads, d_v, D) for p in layer_params])        # (L,H,dv,D)
    w1 = jnp.stack([p[4] for p in layer_params])                                  # (L,D,d_ff)
    w2 = jnp.stack([p[5] for p in layer_params])                                  # (L,d_ff,D)

    # Flatten batch/seq into sublanes so all matmuls cover the whole batch.
    dec2 = dec_inputs.reshape(B * T, D)
    enc2 = enc_outputs.reshape(B * S, D)

    kernel = functools.partial(decoder_kernel, n_heads=n_heads, d_k=d_k, d_v=d_v,
                               batch=B, tgt_len=T, src_len=S)

    resident2 = lambda l: (0, 0)          # activations / output: same block every layer
    per_layer4 = lambda l: (l, 0, 0, 0)   # stacked per-head weights
    per_layer3 = lambda l: (l, 0, 0)      # stacked FFN weights

    out2 = pl.pallas_call(
        kernel,
        out_shape=jax.ShapeDtypeStruct((B * T, D), dec_inputs.dtype),
        grid_spec=pltpu.PrefetchScalarGridSpec(
            num_scalar_prefetch=0,
            grid=(L,),
            in_specs=[
                pl.BlockSpec((B * T, D), resident2),                 # dec (flattened)
                pl.BlockSpec((B * S, D), resident2),                 # enc (flattened)
                pl.BlockSpec((None, n_heads, D, d_k), per_layer4),   # W_Q per-head
                pl.BlockSpec((None, n_heads, D, d_k), per_layer4),   # W_K per-head
                pl.BlockSpec((None, n_heads, D, d_v), per_layer4),   # W_V per-head
                pl.BlockSpec((None, n_heads, d_v, D), per_layer4),   # fc (W_O) per-head
                pl.BlockSpec((None, D, d_ff), per_layer3),           # FFN W1^T
                pl.BlockSpec((None, d_ff, D), per_layer3),           # FFN W2^T
            ],
            out_specs=pl.BlockSpec((B * T, D), resident2),
            scratch_shapes=[pltpu.VMEM((B * T, D), jnp.float32)],    # resident activation
        ),
        compiler_params=pltpu.CompilerParams(
            dimension_semantics=("arbitrary",)),                     # layers are sequential
    )(dec2, enc2, wq, wk, wv, wo, w1, w2)

    return out2.reshape(B, T, D)


# ---------------------- pure-JAX reference (for checking) -------------------
def _ref_layer(x, e, params, *, n_heads, d_k, d_v):
    wq, wk, wv, wo, w1, w2 = params
    T, S = x.shape[1], e.shape[1]
    Q = (x @ wq).reshape(x.shape[0], T, n_heads, d_k).transpose(0, 2, 1, 3)
    K = (e @ wk).reshape(e.shape[0], S, n_heads, d_k).transpose(0, 2, 1, 3)
    V = (e @ wv).reshape(e.shape[0], S, n_heads, d_v).transpose(0, 2, 1, 3)
    scores = jnp.einsum('bhtd,bhsd->bhts', Q, K) / math.sqrt(d_k)
    attn = jax.nn.softmax(scores, axis=-1)
    ctx = jnp.einsum('bhts,bhsd->bhtd', attn, V)
    ctx = ctx.transpose(0, 2, 1, 3).reshape(x.shape[0], T, n_heads * d_v)
    o = ctx @ wo
    a = _layernorm(o + x)
    f = jnp.maximum(a @ w1, 0.0) @ w2
    return _layernorm(f + a)


def _ref_decoder(dec, enc, layer_params, *, n_heads, d_k, d_v):
    out = dec
    for p in layer_params:
        out = _ref_layer(out, enc, p, n_heads=n_heads, d_k=d_k, d_v=d_v)
    return out


if __name__ == "__main__":
    # Small, module-consistent shapes.
    B, tgt_len, src_len = 2, 8, 8
    d_model, d_ff, d_k, d_v, n_heads, n_layers = 32, 64, 8, 8, 4, 2

    key = jax.random.PRNGKey(0)
    key, k_dec, k_enc = jax.random.split(key, 3)
    dec_inputs = jax.random.normal(k_dec, (B, tgt_len, d_model), jnp.float32)
    enc_outputs = jax.random.normal(k_enc, (B, src_len, d_model), jnp.float32)

    def init_linear_t(k, fan_in, fan_out):
        # deterministic init, stored transposed: [in, out]  (y = x @ W)
        bound = 1.0 / math.sqrt(fan_in)
        return jax.random.uniform(k, (fan_in, fan_out), jnp.float32, -bound, bound)

    layer_params = []
    for _ in range(n_layers):
        key, kq, kk, kv, ko, k1, k2 = jax.random.split(key, 7)
        layer_params.append((
            init_linear_t(kq, d_model, n_heads * d_k),   # W_Q^T
            init_linear_t(kk, d_model, n_heads * d_k),   # W_K^T
            init_linear_t(kv, d_model, n_heads * d_v),   # W_V^T
            init_linear_t(ko, n_heads * d_v, d_model),   # fc^T
            init_linear_t(k1, d_model, d_ff),            # FFN W1^T
            init_linear_t(k2, d_ff, d_model),            # FFN W2^T
        ))

    out = decoder_forward(dec_inputs, enc_outputs, layer_params,
                          n_heads=n_heads, d_k=d_k, d_v=d_v)
    out = jax.block_until_ready(out)

    ref = _ref_decoder(dec_inputs, enc_outputs, layer_params,
                       n_heads=n_heads, d_k=d_k, d_v=d_v)
    assert out.shape == (B, tgt_len, d_model)
    # Tolerance relaxed slightly for pl.reciprocal(approx=True) in the softmax.
    assert jnp.allclose(out, ref, rtol=1e-2, atol=1e-2)

    print("KERNEL_OK")
</pallas_src>

<mosaic_0001>
module attributes {stable_mosaic.version = 11 : i64} {
  func.func @decoder_kernel(%arg0: i32, %arg1: memref<16x32xf32, #tpu.memory_space<vmem>>, %arg2: memref<16x32xf32, #tpu.memory_space<vmem>>, %arg3: memref<1x4x32x8xf32, #tpu.memory_space<vmem>>, %arg4: memref<1x4x32x8xf32, #tpu.memory_space<vmem>>, %arg5: memref<1x4x32x8xf32, #tpu.memory_space<vmem>>, %arg6: memref<1x4x8x32xf32, #tpu.memory_space<vmem>>, %arg7: memref<1x32x64xf32, #tpu.memory_space<vmem>>, %arg8: memref<1x64x32xf32, #tpu.memory_space<vmem>>, %arg9: memref<16x32xf32, #tpu.memory_space<vmem>>, %arg10: memref<16x32xf32, #tpu.memory_space<vmem>>) attributes {dimension_semantics = [#tpu.dimension_semantics<arbitrary>], iteration_bounds = array<i64: 2>, scalar_prefetch = 0 : i64, scratch_operands = 1 : i64, tpu.core_type = #tpu.core_type<tc>, window_params = [{pipeline_mode = #tpu.pipeline_mode<synchronous>, transform_indices = @transform_0, window_bounds = array<i64: 16, 32>}, {pipeline_mode = #tpu.pipeline_mode<synchronous>, transform_indices = @transform_1, window_bounds = array<i64: 16, 32>}, {transform_indices = @transform_2, window_bounds = array<i64: 1, 4, 32, 8>}, {transform_indices = @transform_3, window_bounds = array<i64: 1, 4, 32, 8>}, {transform_indices = @transform_4, window_bounds = array<i64: 1, 4, 32, 8>}, {transform_indices = @transform_5, window_bounds = array<i64: 1, 4, 8, 32>}, {transform_indices = @transform_6, window_bounds = array<i64: 1, 32, 64>}, {transform_indices = @transform_7, window_bounds = array<i64: 1, 64, 32>}, {pipeline_mode = #tpu.pipeline_mode<synchronous>, transform_indices = @transform_8, window_bounds = array<i64: 16, 32>}]} {
    %c0_i32 = arith.constant 0 : i32
    %0 = arith.cmpi eq, %arg0, %c0_i32 : i32
    %1 = arith.extui %0 : i1 to i32
    %c0_i32_0 = arith.constant 0 : i32
    %2 = arith.cmpi ne, %1, %c0_i32_0 : i32
    scf.if %2 {
      %c0_144 = arith.constant 0 : index
      %c0_145 = arith.constant 0 : index
      %254 = vector.load %arg1[%c0_144, %c0_145] : memref<16x32xf32, #tpu.memory_space<vmem>>, vector<16x32xf32>
      %c0_146 = arith.constant 0 : index
      %c0_147 = arith.constant 0 : index
      %255 = vector.load %arg10[%c0_146, %c0_147] : memref<16x32xf32, #tpu.memory_space<vmem>>, vector<16x32xf32>
      tpu.vector_store %arg10[%c0_146, %c0_147], %254 {strides = array<i32>} : memref<16x32xf32, #tpu.memory_space<vmem>>, vector<16x32xf32>,
    } else {
    }
    %c0 = arith.constant 0 : index
    %c0_1 = arith.constant 0 : index
    %3 = vector.load %arg10[%c0, %c0_1] : memref<16x32xf32, #tpu.memory_space<vmem>>, vector<16x32xf32>
    %c0_2 = arith.constant 0 : index
    %c0_3 = arith.constant 0 : index
    %4 = vector.load %arg2[%c0_2, %c0_3] : memref<16x32xf32, #tpu.memory_space<vmem>>, vector<16x32xf32>
    %cst = arith.constant 0.000000e+00 : f32
    %5 = vector.broadcast %cst : f32 to vector<16x32xf32>
    %c0_4 = arith.constant 0 : index
    %c0_5 = arith.constant 0 : index
    %c0_6 = arith.constant 0 : index
    %c0_7 = arith.constant 0 : index
    %6 = vector.load %arg3[%c0_4, %c0_5, %c0_6, %c0_7] : memref<1x4x32x8xf32, #tpu.memory_space<vmem>>, vector<1x1x32x8xf32>
    %7 = vector.shape_cast %6 : vector<1x1x32x8xf32> to vector<32x8xf32>
    %c0_8 = arith.constant 0 : index
    %c0_9 = arith.constant 0 : index
    %c0_10 = arith.constant 0 : index
    %c0_11 = arith.constant 0 : index
    %8 = vector.load %arg4[%c0_8, %c0_9, %c0_10, %c0_11] : memref<1x4x32x8xf32, #tpu.memory_space<vmem>>, vector<1x1x32x8xf32>
    %9 = vector.shape_cast %8 : vector<1x1x32x8xf32> to vector<32x8xf32>
    %c0_12 = arith.constant 0 : index
    %c0_13 = arith.constant 0 : index
    %c0_14 = arith.constant 0 : index
    %c0_15 = arith.constant 0 : index
    %10 = vector.load %arg5[%c0_12, %c0_13, %c0_14, %c0_15] : memref<1x4x32x8xf32, #tpu.memory_space<vmem>>, vector<1x1x32x8xf32>
    %11 = vector.shape_cast %10 : vector<1x1x32x8xf32> to vector<32x8xf32>
    %c0_16 = arith.constant 0 : index
    %c0_17 = arith.constant 0 : index
    %c0_18 = arith.constant 0 : index
    %c0_19 = arith.constant 0 : index
    %12 = vector.load %arg6[%c0_16, %c0_17, %c0_18, %c0_19] : memref<1x4x8x32xf32, #tpu.memory_space<vmem>>, vector<1x1x8x32xf32>
    %13 = vector.shape_cast %12 : vector<1x1x8x32xf32> to vector<8x32xf32>
    %cst_20 = arith.constant dense<0.000000e+00> : vector<16x8xf32>
    %14 = tpu.matmul %3, %7, %cst_20 {dimension_numbers = #tpu.dot_dimension_numbers<[1], [0], [0], [1], [0, 0, 1, 1], [], []>} : vector<16x32xf32>, vector<32x8xf32>, vector<16x8xf32> -> vector<16x8xf32>
    %cst_21 = arith.constant dense<0.000000e+00> : vector<16x8xf32>
    %15 = tpu.matmul %4, %9, %cst_21 {dimension_numbers = #tpu.dot_dimension_numbers<[1], [0], [0], [1], [0, 0, 1, 1], [], []>} : vector<16x32xf32>, vector<32x8xf32>, vector<16x8xf32> -> vector<16x8xf32>
    %cst_22 = arith.constant dense<0.000000e+00> : vector<16x8xf32>
    %16 = tpu.matmul %4, %11, %cst_22 {dimension_numbers = #tpu.dot_dimension_numbers<[1], [0], [0], [1], [0, 0, 1, 1], [], []>} : vector<16x32xf32>, vector<32x8xf32>, vector<16x8xf32> -> vector<16x8xf32>
    %17 = vector.extract_strided_slice %14 {offsets = [0, 0], sizes = [8, 8], strides = [1, 1]} : vector<16x8xf32> to vector<8x8xf32>
    %18 = vector.extract_strided_slice %15 {offsets = [0, 0], sizes = [8, 8], strides = [1, 1]} : vector<16x8xf32> to vector<8x8xf32>
    %19 = vector.extract_strided_slice %16 {offsets = [0, 0], sizes = [8, 8], strides = [1, 1]} : vector<16x8xf32> to vector<8x8xf32>
    %20 = tpu.transpose %18, [1, 0] : vector<8x8xf32> -> vector<8x8xf32>
    %cst_23 = arith.constant dense<0.000000e+00> : vector<8x8xf32>
    %21 = tpu.matmul %17, %20, %cst_23 {dimension_numbers = #tpu.dot_dimension_numbers<[1], [0], [0], [1], [0, 0, 1, 1], [], []>} : vector<8x8xf32>, vector<8x8xf32>, vector<8x8xf32> -> vector<8x8xf32>
    %cst_24 = arith.constant 0.353553385 : f32
    %22 = vector.broadcast %cst_24 : f32 to vector<8x8xf32>
    %23 = arith.mulf %21, %22 : vector<8x8xf32>
    %cst_25 = arith.constant dense<0xFF800000> : vector<8xf32>
    %24 = vector.multi_reduction <maximumf>, %23, %cst_25 [1] : vector<8x8xf32> to vector<8xf32>
    %25 = vector.shape_cast %24 : vector<8xf32> to vector<8x1xf32>
    %26 = vector.broadcast %25 : vector<8x1xf32> to vector<8x8xf32>
    %27 = arith.subf %23, %26 : vector<8x8xf32>
    %28 = math.exp %27 : vector<8x8xf32>
    %cst_26 = arith.constant dense<0.000000e+00> : vector<8xf32>
    %29 = vector.multi_reduction <add>, %28, %cst_26 [1] : vector<8x8xf32> to vector<8xf32>
    %30 = vector.shape_cast %29 : vector<8xf32> to vector<8x1xf32>
    %31 = tpu.reciprocal %30 {approx = true} : vector<8x1xf32> -> vector<8x1xf32>
    %32 = vector.broadcast %31 : vector<8x1xf32> to vector<8x8xf32>
    %33 = arith.mulf %28, %32 : vector<8x8xf32>
    %cst_27 = arith.constant dense<0.000000e+00> : vector<8x8xf32>
    %34 = tpu.matmul %33, %19, %cst_27 {dimension_numbers = #tpu.dot_dimension_numbers<[1], [0], [0], [1], [0, 0, 1, 1], [], []>} : vector<8x8xf32>, vector<8x8xf32>, vector<8x8xf32> -> vector<8x8xf32>
    %35 = vector.extract_strided_slice %14 {offsets = [8, 0], sizes = [8, 8], strides = [1, 1]} : vector<16x8xf32> to vector<8x8xf32>
    %36 = vector.extract_strided_slice %15 {offsets = [8, 0], sizes = [8, 8], strides = [1, 1]} : vector<16x8xf32> to vector<8x8xf32>
    %37 = vector.extract_strided_slice %16 {offsets = [8, 0], sizes = [8, 8], strides = [1, 1]} : vector<16x8xf32> to vector<8x8xf32>
    %38 = tpu.transpose %36, [1, 0] : vector<8x8xf32> -> vector<8x8xf32>
    %cst_28 = arith.constant dense<0.000000e+00> : vector<8x8xf32>
    %39 = tpu.matmul %35, %38, %cst_28 {dimension_numbers = #tpu.dot_dimension_numbers<[1], [0], [0], [1], [0, 0, 1, 1], [], []>} : vector<8x8xf32>, vector<8x8xf32>, vector<8x8xf32> -> vector<8x8xf32>
    %cst_29 = arith.constant 0.353553385 : f32
    %40 = vector.broadcast %cst_29 : f32 to vector<8x8xf32>
    %41 = arith.mulf %39, %40 : vector<8x8xf32>
    %cst_30 = arith.constant dense<0xFF800000> : vector<8xf32>
    %42 = vector.multi_reduction <maximumf>, %41, %cst_30 [1] : vector<8x8xf32> to vector<8xf32>
    %43 = vector.shape_cast %42 : vector<8xf32> to vector<8x1xf32>
    %44 = vector.broadcast %43 : vector<8x1xf32> to vector<8x8xf32>
    %45 = arith.subf %41, %44 : vector<8x8xf32>
    %46 = math.exp %45 : vector<8x8xf32>
    %cst_31 = arith.constant dense<0.000000e+00> : vector<8xf32>
    %47 = vector.multi_reduction <add>, %46, %cst_31 [1] : vector<8x8xf32> to vector<8xf32>
    %48 = vector.shape_cast %47 : vector<8xf32> to vector<8x1xf32>
    %49 = tpu.reciprocal %48 {approx = true} : vector<8x1xf32> -> vector<8x1xf32>
    %50 = vector.broadcast %49 : vector<8x1xf32> to vector<8x8xf32>
    %51 = arith.mulf %46, %50 : vector<8x8xf32>
    %cst_32 = arith.constant dense<0.000000e+00> : vector<8x8xf32>
    %52 = tpu.matmul %51, %37, %cst_32 {dimension_numbers = #tpu.dot_dimension_numbers<[1], [0], [0], [1], [0, 0, 1, 1], [], []>} : vector<8x8xf32>, vector<8x8xf32>, vector<8x8xf32> -> vector<8x8xf32>
    %53 = tpu.concatenate %34, %52 in 0 : vector<8x8xf32>, vector<8x8xf32> -> vector<16x8xf32>
    %cst_33 = arith.constant dense<0.000000e+00> : vector<16x32xf32>
    %54 = tpu.matmul %53, %13, %cst_33 {dimension_numbers = #tpu.dot_dimension_numbers<[1], [0], [0], [1], [0, 0, 1, 1], [], []>} : vector<16x8xf32>, vector<8x32xf32>, vector<16x32xf32> -> vector<16x32xf32>
    %55 = arith.addf %5, %54 : vector<16x32xf32>
    %c0_34 = arith.constant 0 : index
    %c1 = arith.constant 1 : index
    %c0_35 = arith.constant 0 : index
    %c0_36 = arith.constant 0 : index
    %56 = vector.load %arg3[%c0_34, %c1, %c0_35, %c0_36] : memref<1x4x32x8xf32, #tpu.memory_space<vmem>>, vector<1x1x32x8xf32>
    %57 = vector.shape_cast %56 : vector<1x1x32x8xf32> to vector<32x8xf32>
    %c0_37 = arith.constant 0 : index
    %c1_38 = arith.constant 1 : index
    %c0_39 = arith.constant 0 : index
    %c0_40 = arith.constant 0 : index
    %58 = vector.load %arg4[%c0_37, %c1_38, %c0_39, %c0_40] : memref<1x4x32x8xf32, #tpu.memory_space<vmem>>, vector<1x1x32x8xf32>
    %59 = vector.shape_cast %58 : vector<1x1x32x8xf32> to vector<32x8xf32>
    %c0_41 = arith.constant 0 : index
    %c1_42 = arith.constant 1 : index
    %c0_43 = arith.constant 0 : index
    %c0_44 = arith.constant 0 : index
    %60 = vector.load %arg5[%c0_41, %c1_42, %c0_43, %c0_44] : memref<1x4x32x8xf32, #tpu.memory_space<vmem>>, vector<1x1x32x8xf32>
    %61 = vector.shape_cast %60 : vector<1x1x32x8xf32> to vector<32x8xf32>
    %c0_45 = arith.constant 0 : index
    %c1_46 = arith.constant 1 : index
    %c0_47 = arith.constant 0 : index
    %c0_48 = arith.constant 0 : index
    %62 = vector.load %arg6[%c0_45, %c1_46, %c0_47, %c0_48] : memref<1x4x8x32xf32, #tpu.memory_space<vmem>>, vector<1x1x8x32xf32>
    %63 = vector.shape_cast %62 : vector<1x1x8x32xf32> to vector<8x32xf32>
    %cst_49 = arith.constant dense<0.000000e+00> : vector<16x8xf32>
    %64 = tpu.matmul %3, %57, %cst_49 {dimension_numbers = #tpu.dot_dimension_numbers<[1], [0], [0], [1], [0, 0, 1, 1], [], []>} : vector<16x32xf32>, vector<32x8xf32>, vector<16x8xf32> -> vector<16x8xf32>
    %cst_50 = arith.constant dense<0.000000e+00> : vector<16x8xf32>
    %65 = tpu.matmul %4, %59, %cst_50 {dimension_numbers = #tpu.dot_dimension_numbers<[1], [0], [0], [1], [0, 0, 1, 1], [], []>} : vector<16x32xf32>, vector<32x8xf32>, vector<16x8xf32> -> vector<16x8xf32>
    %cst_51 = arith.constant dense<0.000000e+00> : vector<16x8xf32>
    %66 = tpu.matmul %4, %61, %cst_51 {dimension_numbers = #tpu.dot_dimension_numbers<[1], [0], [0], [1], [0, 0, 1, 1], [], []>} : vector<16x32xf32>, vector<32x8xf32>, vector<16x8xf32> -> vector<16x8xf32>
    %67 = vector.extract_strided_slice %64 {offsets = [0, 0], sizes = [8, 8], strides = [1, 1]} : vector<16x8xf32> to vector<8x8xf32>
    %68 = vector.extract_strided_slice %65 {offsets = [0, 0], sizes = [8, 8], strides = [1, 1]} : vector<16x8xf32> to vector<8x8xf32>
    %69 = vector.extract_strided_slice %66 {offsets = [0, 0], sizes = [8, 8], strides = [1, 1]} : vector<16x8xf32> to vector<8x8xf32>
    %70 = tpu.transpose %68, [1, 0] : vector<8x8xf32> -> vector<8x8xf32>
    %cst_52 = arith.constant dense<0.000000e+00> : vector<8x8xf32>
    %71 = tpu.matmul %67, %70, %cst_52 {dimension_numbers = #tpu.dot_dimension_numbers<[1], [0], [0], [1], [0, 0, 1, 1], [], []>} : vector<8x8xf32>, vector<8x8xf32>, vector<8x8xf32> -> vector<8x8xf32>
    %cst_53 = arith.constant 0.353553385 : f32
    %72 = vector.broadcast %cst_53 : f32 to vector<8x8xf32>
    %73 = arith.mulf %71, %72 : vector<8x8xf32>
    %cst_54 = arith.constant dense<0xFF800000> : vector<8xf32>
    %74 = vector.multi_reduction <maximumf>, %73, %cst_54 [1] : vector<8x8xf32> to vector<8xf32>
    %75 = vector.shape_cast %74 : vector<8xf32> to vector<8x1xf32>
    %76 = vector.broadcast %75 : vector<8x1xf32> to vector<8x8xf32>
    %77 = arith.subf %73, %76 : vector<8x8xf32>
    %78 = math.exp %77 : vector<8x8xf32>
    %cst_55 = arith.constant dense<0.000000e+00> : vector<8xf32>
    %79 = vector.multi_reduction <add>, %78, %cst_55 [1] : vector<8x8xf32> to vector<8xf32>
    %80 = vector.shape_cast %79 : vector<8xf32> to vector<8x1xf32>
    %81 = tpu.reciprocal %80 {approx = true} : vector<8x1xf32> -> vector<8x1xf32>
    %82 = vector.broadcast %81 : vector<8x1xf32> to vector<8x8xf32>
    %83 = arith.mulf %78, %82 : vector<8x8xf32>
    %cst_56 = arith.constant dense<0.000000e+00> : vector<8x8xf32>
    %84 = tpu.matmul %83, %69, %cst_56 {dimension_numbers = #tpu.dot_dimension_numbers<[1], [0], [0], [1], [0, 0, 1, 1], [], []>} : vector<8x8xf32>, vector<8x8xf32>, vector<8x8xf32> -> vector<8x8xf32>
    %85 = vector.extract_strided_slice %64 {offsets = [8, 0], sizes = [8, 8], strides = [1, 1]} : vector<16x8xf32> to vector<8x8xf32>
    %86 = vector.extract_strided_slice %65 {offsets = [8, 0], sizes = [8, 8], strides = [1, 1]} : vector<16x8xf32> to vector<8x8xf32>
    %87 = vector.extract_strided_slice %66 {offsets = [8, 0], sizes = [8, 8], strides = [1, 1]} : vector<16x8xf32> to vector<8x8xf32>
    %88 = tpu.transpose %86, [1, 0] : vector<8x8xf32> -> vector<8x8xf32>
    %cst_57 = arith.constant dense<0.000000e+00> : vector<8x8xf32>
    %89 = tpu.matmul %85, %88, %cst_57 {dimension_numbers = #tpu.dot_dimension_numbers<[1], [0], [0], [1], [0, 0, 1, 1], [], []>} : vector<8x8xf32>, vector<8x8xf32>, vector<8x8xf32> -> vector<8x8xf32>
    %cst_58 = arith.constant 0.353553385 : f32
    %90 = vector.broadcast %cst_58 : f32 to vector<8x8xf32>
    %91 = arith.mulf %89, %90 : vector<8x8xf32>
    %cst_59 = arith.constant dense<0xFF800000> : vector<8xf32>
    %92 = vector.multi_reduction <maximumf>, %91, %cst_59 [1] : vector<8x8xf32> to vector<8xf32>
    %93 = vector.shape_cast %92 : vector<8xf32> to vector<8x1xf32>
    %94 = vector.broadcast %93 : vector<8x1xf32> to vector<8x8xf32>
    %95 = arith.subf %91, %94 : vector<8x8xf32>
    %96 = math.exp %95 : vector<8x8xf32>
    %cst_60 = arith.constant dense<0.000000e+00> : vector<8xf32>
    %97 = vector.multi_reduction <add>, %96, %cst_60 [1] : vector<8x8xf32> to vector<8xf32>
    %98 = vector.shape_cast %97 : vector<8xf32> to vector<8x1xf32>
    %99 = tpu.reciprocal %98 {approx = true} : vector<8x1xf32> -> vector<8x1xf32>
    %100 = vector.broadcast %99 : vector<8x1xf32> to vector<8x8xf32>
    %101 = arith.mulf %96, %100 : vector<8x8xf32>
    %cst_61 = arith.constant dense<0.000000e+00> : vector<8x8xf32>
    %102 = tpu.matmul %101, %87, %cst_61 {dimension_numbers = #tpu.dot_dimension_numbers<[1], [0], [0], [1], [0, 0, 1, 1], [], []>} : vector<8x8xf32>, vector<8x8xf32>, vector<8x8xf32> -> vector<8x8xf32>
    %103 = tpu.concatenate %84, %102 in 0 : vector<8x8xf32>, vector<8x8xf32> -> vector<16x8xf32>
    %cst_62 = arith.constant dense<0.000000e+00> : vector<16x32xf32>
    %104 = tpu.matmul %103, %63, %cst_62 {dimension_numbers = #tpu.dot_dimension_numbers<[1], [0], [0], [1], [0, 0, 1, 1], [], []>} : vector<16x8xf32>, vector<8x32xf32>, vector<16x32xf32> -> vector<16x32xf32>
    %105 = arith.addf %55, %104 : vector<16x32xf32>
    %c0_63 = arith.constant 0 : index
    %c2 = arith.constant 2 : index
    %c0_64 = arith.constant 0 : index
    %c0_65 = arith.constant 0 : index
    %106 = vector.load %arg3[%c0_63, %c2, %c0_64, %c0_65] : memref<1x4x32x8xf32, #tpu.memory_space<vmem>>, vector<1x1x32x8xf32>
    %107 = vector.shape_cast %106 : vector<1x1x32x8xf32> to vector<32x8xf32>
    %c0_66 = arith.constant 0 : index
    %c2_67 = arith.constant 2 : index
    %c0_68 = arith.constant 0 : index
    %c0_69 = arith.constant 0 : index
    %108 = vector.load %arg4[%c0_66, %c2_67, %c0_68, %c0_69] : memref<1x4x32x8xf32, #tpu.memory_space<vmem>>, vector<1x1x32x8xf32>
    %109 = vector.shape_cast %108 : vector<1x1x32x8xf32> to vector<32x8xf32>
    %c0_70 = arith.constant 0 : index
    %c2_71 = arith.constant 2 : index
    %c0_72 = arith.constant 0 : index
    %c0_73 = arith.constant 0 : index
    %110 = vector.load %arg5[%c0_70, %c2_71, %c0_72, %c0_73] : memref<1x4x32x8xf32, #tpu.memory_space<vmem>>, vector<1x1x32x8xf32>
    %111 = vector.shape_cast %110 : vector<1x1x32x8xf32> to vector<32x8xf32>
    %c0_74 = arith.constant 0 : index
    %c2_75 = arith.constant 2 : index
    %c0_76 = arith.constant 0 : index
    %c0_77 = arith.constant 0 : index
    %112 = vector.load %arg6[%c0_74, %c2_75, %c0_76, %c0_77] : memref<1x4x8x32xf32, #tpu.memory_space<vmem>>, vector<1x1x8x32xf32>
    %113 = vector.shape_cast %112 : vector<1x1x8x32xf32> to vector<8x32xf32>
    %cst_78 = arith.constant dense<0.000000e+00> : vector<16x8xf32>
    %114 = tpu.matmul %3, %107, %cst_78 {dimension_numbers = #tpu.dot_dimension_numbers<[1], [0], [0], [1], [0, 0, 1, 1], [], []>} : vector<16x32xf32>, vector<32x8xf32>, vector<16x8xf32> -> vector<16x8xf32>
    %cst_79 = arith.constant dense<0.000000e+00> : vector<16x8xf32>
    %115 = tpu.matmul %4, %109, %cst_79 {dimension_numbers = #tpu.dot_dimension_numbers<[1], [0], [0], [1], [0, 0, 1, 1], [], []>} : vector<16x32xf32>, vector<32x8xf32>, vector<16x8xf32> -> vector<16x8xf32>
    %cst_80 = arith.constant dense<0.000000e+00> : vector<16x8xf32>
    %116 = tpu.matmul %4, %111, %cst_80 {dimension_numbers = #tpu.dot_dimension_numbers<[1], [0], [0], [1], [0, 0, 1, 1], [], []>} : vector<16x32xf32>, vector<32x8xf32>, vector<16x8xf32> -> vector<16x8xf32>
    %117 = vector.extract_strided_slice %114 {offsets = [0, 0], sizes = [8, 8], strides = [1, 1]} : vector<16x8xf32> to vector<8x8xf32>
    %118 = vector.extract_strided_slice %115 {offsets = [0, 0], sizes = [8, 8], strides = [1, 1]} : vector<16x8xf32> to vector<8x8xf32>
    %119 = vector.extract_strided_slice %116 {offsets = [0, 0], sizes = [8, 8], strides = [1, 1]} : vector<16x8xf32> to vector<8x8xf32>
    %120 = tpu.transpose %118, [1, 0] : vector<8x8xf32> -> vector<8x8xf32>
    %cst_81 = arith.constant dense<0.000000e+00> : vector<8x8xf32>
    %121 = tpu.matmul %117, %120, %cst_81 {dimension_numbers = #tpu.dot_dimension_numbers<[1], [0], [0], [1], [0, 0, 1, 1], [], []>} : vector<8x8xf32>, vector<8x8xf32>, vector<8x8xf32> -> vector<8x8xf32>
    %cst_82 = arith.constant 0.353553385 : f32
    %122 = vector.broadcast %cst_82 : f32 to vector<8x8xf32>
    %123 = arith.mulf %121, %122 : vector<8x8xf32>
    %cst_83 = arith.constant dense<0xFF800000> : vector<8xf32>
    %124 = vector.multi_reduction <maximumf>, %123, %cst_83 [1] : vector<8x8xf32> to vector<8xf32>
    %125 = vector.shape_cast %124 : vector<8xf32> to vector<8x1xf32>
    %126 = vector.broadcast %125 : vector<8x1xf32> to vector<8x8xf32>
    %127 = arith.subf %123, %126 : vector<8x8xf32>
    %128 = math.exp %127 : vector<8x8xf32>
    %cst_84 = arith.constant dense<0.000000e+00> : vector<8xf32>
    %129 = vector.multi_reduction <add>, %128, %cst_84 [1] : vector<8x8xf32> to vector<8xf32>
    %130 = vector.shape_cast %129 : vector<8xf32> to vector<8x1xf32>
    %131 = tpu.reciprocal %130 {approx = true} : vector<8x1xf32> -> vector<8x1xf32>
    %132 = vector.broadcast %131 : vector<8x1xf32> to vector<8x8xf32>
    %133 = arith.mulf %128, %132 : vector<8x8xf32>
    %cst_85 = arith.constant dense<0.000000e+00> : vector<8x8xf32>
    %134 = tpu.matmul %133, %119, %cst_85 {dimension_numbers = #tpu.dot_dimension_numbers<[1], [0], [0], [1], [0, 0, 1, 1], [], []>} : vector<8x8xf32>, vector<8x8xf32>, vector<8x8xf32> -> vector<8x8xf32>
    %135 = vector.extract_strided_slice %114 {offsets = [8, 0], sizes = [8, 8], strides = [1, 1]} : vector<16x8xf32> to vector<8x8xf32>
    %136 = vector.extract_strided_slice %115 {offsets = [8, 0], sizes = [8, 8], strides = [1, 1]} : vector<16x8xf32> to vector<8x8xf32>
    %137 = vector.extract_strided_slice %116 {offsets = [8, 0], sizes = [8, 8], strides = [1, 1]} : vector<16x8xf32> to vector<8x8xf32>
    %138 = tpu.transpose %136, [1, 0] : vector<8x8xf32> -> vector<8x8xf32>
    %cst_86 = arith.constant dense<0.000000e+00> : vector<8x8xf32>
    %139 = tpu.matmul %135, %138, %cst_86 {dimension_numbers = #tpu.dot_dimension_numbers<[1], [0], [0], [1], [0, 0, 1, 1], [], []>} : vector<8x8xf32>, vector<8x8xf32>, vector<8x8xf32> -> vector<8x8xf32>
    %cst_87 = arith.constant 0.353553385 : f32
    %140 = vector.broadcast %cst_87 : f32 to vector<8x8xf32>
    %141 = arith.mulf %139, %140 : vector<8x8xf32>
    %cst_88 = arith.constant dense<0xFF800000> : vector<8xf32>
    %142 = vector.multi_reduction <maximumf>, %141, %cst_88 [1] : vector<8x8xf32> to vector<8xf32>
    %143 = vector.shape_cast %142 : vector<8xf32> to vector<8x1xf32>
    %144 = vector.broadcast %143 : vector<8x1xf32> to vector<8x8xf32>
    %145 = arith.subf %141, %144 : vector<8x8xf32>
    %146 = math.exp %145 : vector<8x8xf32>
    %cst_89 = arith.constant dense<0.000000e+00> : vector<8xf32>
    %147 = vector.multi_reduction <add>, %146, %cst_89 [1] : vector<8x8xf32> to vector<8xf32>
    %148 = vector.shape_cast %147 : vector<8xf32> to vector<8x1xf32>
    %149 = tpu.reciprocal %148 {approx = true} : vector<8x1xf32> -> vector<8x1xf32>
    %150 = vector.broadcast %149 : vector<8x1xf32> to vector<8x8xf32>
    %151 = arith.mulf %146, %150 : vector<8x8xf32>
    %cst_90 = arith.constant dense<0.000000e+00> : vector<8x8xf32>
    %152 = tpu.matmul %151, %137, %cst_90 {dimension_numbers = #tpu.dot_dimension_numbers<[1], [0], [0], [1], [0, 0, 1, 1], [], []>} : vector<8x8xf32>, vector<8x8xf32>, vector<8x8xf32> -> vector<8x8xf32>
    %153 = tpu.concatenate %134, %152 in 0 : vector<8x8xf32>, vector<8x8xf32> -> vector<16x8xf32>
    %cst_91 = arith.constant dense<0.000000e+00> : vector<16x32xf32>
    %154 = tpu.matmul %153, %113, %cst_91 {dimension_numbers = #tpu.dot_dimension_numbers<[1], [0], [0], [1], [0, 0, 1, 1], [], []>} : vector<16x8xf32>, vector<8x32xf32>, vector<16x32xf32> -> vector<16x32xf32>
    %155 = arith.addf %105, %154 : vector<16x32xf32>
    %c0_92 = arith.constant 0 : index
    %c3 = arith.constant 3 : index
    %c0_93 = arith.constant 0 : index
    %c0_94 = arith.constant 0 : index
    %156 = vector.load %arg3[%c0_92, %c3, %c0_93, %c0_94] : memref<1x4x32x8xf32, #tpu.memory_space<vmem>>, vector<1x1x32x8xf32>
    %157 = vector.shape_cast %156 : vector<1x1x32x8xf32> to vector<32x8xf32>
    %c0_95 = arith.constant 0 : index
    %c3_96 = arith.constant 3 : index
    %c0_97 = arith.constant 0 : index
    %c0_98 = arith.constant 0 : index
    %158 = vector.load %arg4[%c0_95, %c3_96, %c0_97, %c0_98] : memref<1x4x32x8xf32, #tpu.memory_space<vmem>>, vector<1x1x32x8xf32>
    %159 = vector.shape_cast %158 : vector<1x1x32x8xf32> to vector<32x8xf32>
    %c0_99 = arith.constant 0 : index
    %c3_100 = arith.constant 3 : index
    %c0_101 = arith.constant 0 : index
    %c0_102 = arith.constant 0 : index
    %160 = vector.load %arg5[%c0_99, %c3_100, %c0_101, %c0_102] : memref<1x4x32x8xf32, #tpu.memory_space<vmem>>, vector<1x1x32x8xf32>
    %161 = vector.shape_cast %160 : vector<1x1x32x8xf32> to vector<32x8xf32>
    %c0_103 = arith.constant 0 : index
    %c3_104 = arith.constant 3 : index
    %c0_105 = arith.constant 0 : index
    %c0_106 = arith.constant 0 : index
    %162 = vector.load %arg6[%c0_103, %c3_104, %c0_105, %c0_106] : memref<1x4x8x32xf32, #tpu.memory_space<vmem>>, vector<1x1x8x32xf32>
    %163 = vector.shape_cast %162 : vector<1x1x8x32xf32> to vector<8x32xf32>
    %cst_107 = arith.constant dense<0.000000e+00> : vector<16x8xf32>
    %164 = tpu.matmul %3, %157, %cst_107 {dimension_numbers = #tpu.dot_dimension_numbers<[1], [0], [0], [1], [0, 0, 1, 1], [], []>} : vector<16x32xf32>, vector<32x8xf32>, vector<16x8xf32> -> vector<16x8xf32>
    %cst_108 = arith.constant dense<0.000000e+00> : vector<16x8xf32>
    %165 = tpu.matmul %4, %159, %cst_108 {dimension_numbers = #tpu.dot_dimension_numbers<[1], [0], [0], [1], [0, 0, 1, 1], [], []>} : vector<16x32xf32>, vector<32x8xf32>, vector<16x8xf32> -> vector<16x8xf32>
    %cst_109 = arith.constant dense<0.000000e+00> : vector<16x8xf32>
    %166 = tpu.matmul %4, %161, %cst_109 {dimension_numbers = #tpu.dot_dimension_numbers<[1], [0], [0], [1], [0, 0, 1, 1], [], []>} : vector<16x32xf32>, vector<32x8xf32>, vector<16x8xf32> -> vector<16x8xf32>
    %167 = vector.extract_strided_slice %164 {offsets = [0, 0], sizes = [8, 8], strides = [1, 1]} : vector<16x8xf32> to vector<8x8xf32>
    %168 = vector.extract_strided_slice %165 {offsets = [0, 0], sizes = [8, 8], strides = [1, 1]} : vector<16x8xf32> to vector<8x8xf32>
    %169 = vector.extract_strided_slice %166 {offsets = [0, 0], sizes = [8, 8], strides = [1, 1]} : vector<16x8xf32> to vector<8x8xf32>
    %170 = tpu.transpose %168, [1, 0] : vector<8x8xf32> -> vector<8x8xf32>
    %cst_110 = arith.constant dense<0.000000e+00> : vector<8x8xf32>
    %171 = tpu.matmul %167, %170, %cst_110 {dimension_numbers = #tpu.dot_dimension_numbers<[1], [0], [0], [1], [0, 0, 1, 1], [], []>} : vector<8x8xf32>, vector<8x8xf32>, vector<8x8xf32> -> vector<8x8xf32>
    %cst_111 = arith.constant 0.353553385 : f32
    %172 = vector.broadcast %cst_111 : f32 to vector<8x8xf32>
    %173 = arith.mulf %171, %172 : vector<8x8xf32>
    %cst_112 = arith.constant dense<0xFF800000> : vector<8xf32>
    %174 = vector.multi_reduction <maximumf>, %173, %cst_112 [1] : vector<8x8xf32> to vector<8xf32>
    %175 = vector.shape_cast %174 : vector<8xf32> to vector<8x1xf32>
    %176 = vector.broadcast %175 : vector<8x1xf32> to vector<8x8xf32>
    %177 = arith.subf %173, %176 : vector<8x8xf32>
    %178 = math.exp %177 : vector<8x8xf32>
    %cst_113 = arith.constant dense<0.000000e+00> : vector<8xf32>
    %179 = vector.multi_reduction <add>, %178, %cst_113 [1] : vector<8x8xf32> to vector<8xf32>
    %180 = vector.shape_cast %179 : vector<8xf32> to vector<8x1xf32>
    %181 = tpu.reciprocal %180 {approx = true} : vector<8x1xf32> -> vector<8x1xf32>
    %182 = vector.broadcast %181 : vector<8x1xf32> to vector<8x8xf32>
    %183 = arith.mulf %178, %182 : vector<8x8xf32>
    %cst_114 = arith.constant dense<0.000000e+00> : vector<8x8xf32>
    %184 = tpu.matmul %183, %169, %cst_114 {dimension_numbers = #tpu.dot_dimension_numbers<[1], [0], [0], [1], [0, 0, 1, 1], [], []>} : vector<8x8xf32>, vector<8x8xf32>, vector<8x8xf32> -> vector<8x8xf32>
    %185 = vector.extract_strided_slice %164 {offsets = [8, 0], sizes = [8, 8], strides = [1, 1]} : vector<16x8xf32> to vector<8x8xf32>
    %186 = vector.extract_strided_slice %165 {offsets = [8, 0], sizes = [8, 8], strides = [1, 1]} : vector<16x8xf32> to vector<8x8xf32>
    %187 = vector.extract_strided_slice %166 {offsets = [8, 0], sizes = [8, 8], strides = [1, 1]} : vector<16x8xf32> to vector<8x8xf32>
    %188 = tpu.transpose %186, [1, 0] : vector<8x8xf32> -> vector<8x8xf32>
    %cst_115 = arith.constant dense<0.000000e+00> : vector<8x8xf32>
    %189 = tpu.matmul %185, %188, %cst_115 {dimension_numbers = #tpu.dot_dimension_numbers<[1], [0], [0], [1], [0, 0, 1, 1], [], []>} : vector<8x8xf32>, vector<8x8xf32>, vector<8x8xf32> -> vector<8x8xf32>
    %cst_116 = arith.constant 0.353553385 : f32
    %190 = vector.broadcast %cst_116 : f32 to vector<8x8xf32>
    %191 = arith.mulf %189, %190 : vector<8x8xf32>
    %cst_117 = arith.constant dense<0xFF800000> : vector<8xf32>
    %192 = vector.multi_reduction <maximumf>, %191, %cst_117 [1] : vector<8x8xf32> to vector<8xf32>
    %193 = vector.shape_cast %192 : vector<8xf32> to vector<8x1xf32>
    %194 = vector.broadcast %193 : vector<8x1xf32> to vector<8x8xf32>
    %195 = arith.subf %191, %194 : vector<8x8xf32>
    %196 = math.exp %195 : vector<8x8xf32>
    %cst_118 = arith.constant dense<0.000000e+00> : vector<8xf32>
    %197 = vector.multi_reduction <add>, %196, %cst_118 [1] : vector<8x8xf32> to vector<8xf32>
    %198 = vector.shape_cast %197 : vector<8xf32> to vector<8x1xf32>
    %199 = tpu.reciprocal %198 {approx = true} : vector<8x1xf32> -> vector<8x1xf32>
    %200 = vector.broadcast %199 : vector<8x1xf32> to vector<8x8xf32>
    %201 = arith.mulf %196, %200 : vector<8x8xf32>
    %cst_119 = arith.constant dense<0.000000e+00> : vector<8x8xf32>
    %202 = tpu.matmul %201, %187, %cst_119 {dimension_numbers = #tpu.dot_dimension_numbers<[1], [0], [0], [1], [0, 0, 1, 1], [], []>} : vector<8x8xf32>, vector<8x8xf32>, vector<8x8xf32> -> vector<8x8xf32>
    %203 = tpu.concatenate %184, %202 in 0 : vector<8x8xf32>, vector<8x8xf32> -> vector<16x8xf32>
    %cst_120 = arith.constant dense<0.000000e+00> : vector<16x32xf32>
    %204 = tpu.matmul %203, %163, %cst_120 {dimension_numbers = #tpu.dot_dimension_numbers<[1], [0], [0], [1], [0, 0, 1, 1], [], []>} : vector<16x8xf32>, vector<8x32xf32>, vector<16x32xf32> -> vector<16x32xf32>
    %205 = arith.addf %155, %204 : vector<16x32xf32>
    %206 = arith.addf %205, %3 : vector<16x32xf32>
    %cst_121 = arith.constant dense<0.000000e+00> : vector<16xf32>
    %207 = vector.multi_reduction <add>, %206, %cst_121 [1] : vector<16x32xf32> to vector<16xf32>
    %208 = vector.shape_cast %207 : vector<16xf32> to vector<16x1xf32>
    %cst_122 = arith.constant 3.200000e+01 : f32
    %209 = vector.broadcast %cst_122 : f32 to vector<16x1xf32>
    %210 = arith.divf %208, %209 : vector<16x1xf32>
    %211 = vector.broadcast %210 : vector<16x1xf32> to vector<16x32xf32>
    %212 = arith.subf %206, %211 : vector<16x32xf32>
    %213 = arith.mulf %212, %212 : vector<16x32xf32>
    %cst_123 = arith.constant dense<0.000000e+00> : vector<16xf32>
    %214 = vector.multi_reduction <add>, %213, %cst_123 [1] : vector<16x32xf32> to vector<16xf32>
    %215 = vector.shape_cast %214 : vector<16xf32> to vector<16x1xf32>
    %cst_124 = arith.constant 3.200000e+01 : f32
    %216 = vector.broadcast %cst_124 : f32 to vector<16x1xf32>
    %217 = arith.divf %215, %216 : vector<16x1xf32>
    %218 = vector.broadcast %210 : vector<16x1xf32> to vector<16x32xf32>
    %219 = arith.subf %206, %218 : vector<16x32xf32>
    %cst_125 = arith.constant 9.99999974E-6 : f32
    %220 = vector.broadcast %cst_125 : f32 to vector<16x1xf32>
    %221 = arith.addf %217, %220 : vector<16x1xf32>
    %222 = math.rsqrt %221 : vector<16x1xf32>
    %223 = vector.broadcast %222 : vector<16x1xf32> to vector<16x32xf32>
    %224 = arith.mulf %219, %223 : vector<16x32xf32>
    %c0_126 = arith.constant 0 : index
    %c0_127 = arith.constant 0 : index
    %c0_128 = arith.constant 0 : index
    %225 = vector.load %arg7[%c0_126, %c0_127, %c0_128] : memref<1x32x64xf32, #tpu.memory_space<vmem>>, vector<1x32x64xf32>
    %226 = vector.shape_cast %225 : vector<1x32x64xf32> to vector<32x64xf32>
    %cst_129 = arith.constant dense<0.000000e+00> : vector<16x64xf32>
    %227 = tpu.matmul %224, %226, %cst_129 {dimension_numbers = #tpu.dot_dimension_numbers<[1], [0], [0], [1], [0, 0, 1, 1], [], []>} : vector<16x32xf32>, vector<32x64xf32>, vector<16x64xf32> -> vector<16x64xf32>
    %cst_130 = arith.constant 0.000000e+00 : f32
    %228 = vector.broadcast %cst_130 : f32 to vector<16x64xf32>
    %229 = arith.maximumf %227, %228 : vector<16x64xf32>
    %c0_131 = arith.constant 0 : index
    %c0_132 = arith.constant 0 : index
    %c0_133 = arith.constant 0 : index
    %230 = vector.load %arg8[%c0_131, %c0_132, %c0_133] : memref<1x64x32xf32, #tpu.memory_space<vmem>>, vector<1x64x32xf32>
    %231 = vector.shape_cast %230 : vector<1x64x32xf32> to vector<64x32xf32>
    %cst_134 = arith.constant dense<0.000000e+00> : vector<16x32xf32>
    %232 = tpu.matmul %229, %231, %cst_134 {dimension_numbers = #tpu.dot_dimension_numbers<[1], [0], [0], [1], [0, 0, 1, 1], [], []>} : vector<16x64xf32>, vector<64x32xf32>, vector<16x32xf32> -> vector<16x32xf32>
    %233 = arith.addf %232, %224 : vector<16x32xf32>
    %cst_135 = arith.constant dense<0.000000e+00> : vector<16xf32>
    %234 = vector.multi_reduction <add>, %233, %cst_135 [1] : vector<16x32xf32> to vector<16xf32>
    %235 = vector.shape_cast %234 : vector<16xf32> to vector<16x1xf32>
    %cst_136 = arith.constant 3.200000e+01 : f32
    %236 = vector.broadcast %cst_136 : f32 to vector<16x1xf32>
    %237 = arith.divf %235, %236 : vector<16x1xf32>
    %238 = vector.broadcast %237 : vector<16x1xf32> to vector<16x32xf32>
    %239 = arith.subf %233, %238 : vector<16x32xf32>
    %240 = arith.mulf %239, %239 : vector<16x32xf32>
    %cst_137 = arith.constant dense<0.000000e+00> : vector<16xf32>
    %241 = vector.multi_reduction <add>, %240, %cst_137 [1] : vector<16x32xf32> to vector<16xf32>
    %242 = vector.shape_cast %241 : vector<16xf32> to vector<16x1xf32>
    %cst_138 = arith.constant 3.200000e+01 : f32
    %243 = vector.broadcast %cst_138 : f32 to vector<16x1xf32>
    %244 = arith.divf %242, %243 : vector<16x1xf32>
    %245 = vector.broadcast %237 : vector<16x1xf32> to vector<16x32xf32>
    %246 = arith.subf %233, %245 : vector<16x32xf32>
    %cst_139 = arith.constant 9.99999974E-6 : f32
    %247 = vector.broadcast %cst_139 : f32 to vector<16x1xf32>
    %248 = arith.addf %244, %247 : vector<16x1xf32>
    %249 = math.rsqrt %248 : vector<16x1xf32>
    %250 = vector.broadcast %249 : vector<16x1xf32> to vector<16x32xf32>
    %251 = arith.mulf %246, %250 : vector<16x32xf32>
    %c0_140 = arith.constant 0 : index
    %c0_141 = arith.constant 0 : index
    %252 = vector.load %arg10[%c0_140, %c0_141] : memref<16x32xf32, #tpu.memory_space<vmem>>, vector<16x32xf32>
    tpu.vector_store %arg10[%c0_140, %c0_141], %251 {strides = array<i32>} : memref<16x32xf32, #tpu.memory_space<vmem>>, vector<16x32xf32>,
    %c0_142 = arith.constant 0 : index
    %c0_143 = arith.constant 0 : index
    %253 = vector.load %arg9[%c0_142, %c0_143] : memref<16x32xf32, #tpu.memory_space<vmem>>, vector<16x32xf32>
    tpu.vector_store %arg9[%c0_142, %c0_143], %251 {strides = array<i32>} : memref<16x32xf32, #tpu.memory_space<vmem>>, vector<16x32xf32>,
    return
  }
  func.func @transform_0(%arg0: i32) -> (i32, i32) {
    %c0_i32 = arith.constant 0 : i32
    %c0_i32_0 = arith.constant 0 : i32
    %c0_i32_1 = arith.constant 0 : i32
    return %c0_i32, %c0_i32_0 : i32, i32
  }
  func.func @transform_1(%arg0: i32) -> (i32, i32) {
    %c0_i32 = arith.constant 0 : i32
    %c0_i32_0 = arith.constant 0 : i32
    %c0_i32_1 = arith.constant 0 : i32
    return %c0_i32, %c0_i32_0 : i32, i32
  }
  func.func @transform_2(%arg0: i32) -> (i32, i32, i32, i32) {
    %c0_i32 = arith.constant 0 : i32
    %c0_i32_0 = arith.constant 0 : i32
    %c0_i32_1 = arith.constant 0 : i32
    %c0_i32_2 = arith.constant 0 : i32
    return %arg0, %c0_i32, %c0_i32_0, %c0_i32_1 : i32, i32, i32, i32
  }
  func.func @transform_3(%arg0: i32) -> (i32, i32, i32, i32) {
    %c0_i32 = arith.constant 0 : i32
    %c0_i32_0 = arith.constant 0 : i32
    %c0_i32_1 = arith.constant 0 : i32
    %c0_i32_2 = arith.constant 0 : i32
    return %arg0, %c0_i32, %c0_i32_0, %c0_i32_1 : i32, i32, i32, i32
  }
  func.func @transform_4(%arg0: i32) -> (i32, i32, i32, i32) {
    %c0_i32 = arith.constant 0 : i32
    %c0_i32_0 = arith.constant 0 : i32
    %c0_i32_1 = arith.constant 0 : i32
    %c0_i32_2 = arith.constant 0 : i32
    return %arg0, %c0_i32, %c0_i32_0, %c0_i32_1 : i32, i32, i32, i32
  }
  func.func @transform_5(%arg0: i32) -> (i32, i32, i32, i32) {
    %c0_i32 = arith.constant 0 : i32
    %c0_i32_0 = arith.constant 0 : i32
    %c0_i32_1 = arith.constant 0 : i32
    %c0_i32_2 = arith.constant 0 : i32
    return %arg0, %c0_i32, %c0_i32_0, %c0_i32_1 : i32, i32, i32, i32
  }
  func.func @transform_6(%arg0: i32) -> (i32, i32, i32) {
    %c0_i32 = arith.constant 0 : i32
    %c0_i32_0 = arith.constant 0 : i32
    %c0_i32_1 = arith.constant 0 : i32
    return %arg0, %c0_i32, %c0_i32_0 : i32, i32, i32
  }
  func.func @transform_7(%arg0: i32) -> (i32, i32, i32) {
    %c0_i32 = arith.constant 0 : i32
    %c0_i32_0 = arith.constant 0 : i32
    %c0_i32_1 = arith.constant 0 : i32
    return %arg0, %c0_i32, %c0_i32_0 : i32, i32, i32
  }
  func.func @transform_8(%arg0: i32) -> (i32, i32) {
    %c0_i32 = arith.constant 0 : i32
    %c0_i32_0 = arith.constant 0 : i32
    %c0_i32_1 = arith.constant 0 : i32
    return %c0_i32, %c0_i32_0 : i32, i32
  }
}

</mosaic_0001>

<bundles_post_ra>
// kernel: tpu_custom_call.1
= control target key start
LH: loop header
LB: loop body
LE: loop exit
PB: predicated region body
PF: predicated region fallthrough
CT: control target
= control target key end

     0   :  { %13 = vsyncpa [#allocation4], 0  ;;  %s4136_s27 = smov 0   ;;  %s4458_s0 = inlined_call_operand.vmem [shape: f32[16,32], index: 0, kind: input, shape index: {}]   ;;  %s4459_s1 = inlined_call_operand.vmem [shape: f32[16,32], index: 1, kind: input, shape index: {}]   ;;  %s4460_s2 = inlined_call_operand.vmem [shape: f32[2,4,32,8], index: 2, kind: input, shape index: {}]   ;;  %s4461_s3 = inlined_call_operand.vmem [shape: f32[2,4,32,8], index: 3, kind: input, shape index: {}]   ;;  %s4462_s4 = inlined_call_operand.vmem [shape: f32[2,4,32,8], index: 4, kind: input, shape index: {}]   ;;  %s4463_s5 = inlined_call_operand.vmem [shape: f32[2,4,8,32], index: 5, kind: input, shape index: {}]   ;;  %s4464_s6 = inlined_call_operand.vmem [shape: f32[2,32,64], index: 6, kind: input, shape index: {}]   ;;  %s4465_s7 = inlined_call_operand.vmem [shape: f32[2,64,32], index: 7, kind: input, shape index: {}]   ;;  %s4466_s8 = inlined_call_operand.hbm [shape: f32[16,32], index: 8, kind: output, shape index: {}]  }
   0x1 LB: > { %s4142_s28 = sadd.s32 4294967295, %s4084_s27   ;;  %p3346_p0 = scmp.ge.s32.totalorder %s4084_s27, 1  ;;  %s4084_s27 = sphi %s4136_s27, %s19_s27  }
   0x2   : > { %p308_p1 = scmp.lt.s32.totalorder %s4084_s27, 3 }
   0x4   : > { %p309_p2 = pnand %p3346_p0, %p308_p1 }
   0x5   : > { %p362_p3 = scmp.lt.s32.totalorder (!%p309_p2), %s4142_s28, 1  ;;  %p3359_p4 = scmp.ne.s32.totalorder (!%p309_p2), %s4142_s28, 0 }
   0x6   : > { %312 = sbr.rel (%p309_p2) target bundleno = 4981 (0x1375), region = 52 }
   0xd   : > { %s363_s29 = scalar_select %p362_p3, %s4142_s28, 1 }
   0xe   : > { %395 = sbr.rel (%p3359_p4) target bundleno = 21 (0x15), region = 56  ;;  %v396_v0 = vld [vmem:[%s4458_s0] sm:$0xff] (!%p3359_p4)  ;;  %vm398_vm0 = vcmask (!%p3359_p4), 261120   ;;  %v397_v1 = vld [vmem:[%s4458_s0 + $0x8] sm:$0xff] (!%p3359_p4) }
   0xf   : > { %s3463_s30 = sshll.u32 %s363_s29, 7  ;;  %s3466_s9 = sshll.u32 %s363_s29, 5  ;;  %399 = vst.msk [vmem:[#allocation2] sm:$0xff] (!%p3359_p4), %vm398_vm0, %v396_v0  ;;  %400 = vst.msk [vmem:[#allocation2 + $0x8] sm:$0xff] (!%p3359_p4), %vm398_vm0, %v397_v1 }
  0x10   : > { %s4151_s12 = scalar_lea.vmem %s4460_s2, %s3463_s30  ;;  %s4156_s15 = scalar_lea.vmem %s4461_s3, %s3463_s30 }
  0x11   : > { %s4161_s18 = scalar_lea.vmem %s4462_s4, %s3463_s30  ;;  %s4166_s21 = scalar_lea.vmem %s4463_s5, %s3466_s9 }
  0x12   : > { %s4171_s24 = scalar_lea.vmem %s4464_s6, %s3466_s9  ;;  %s3468_s25 = sshll.u32 %s363_s29, 6 }
  0x13   : > { %s4176_s11 = scalar_lea.vmem %s4465_s7, %s3468_s25 }
  0x15 PF: > { %v405_v2 = vld [vmem:[%s4151_s12] sm:$0xff]  ;;  %v406_v3 = vld [vmem:[%s4151_s12 + $0x8] sm:$0xff]  ;;  %v407_v4 = vld [vmem:[%s4151_s12 + $0x10] sm:$0xff]  ;;  %vm418_vm1 = vcmask 261120   ;;  %v4086_v24 = vmov 0.0   ;;  %vm4087_vm2 = vmmov 0  }
  0x16   : > { %v3863_v5 = vpack.c.bf16 %v406_v3, %v405_v2  ;;  %v408_v6 = vld [vmem:[%s4151_s12 + $0x18] sm:$0xff]  ;;  %v4189_v7 = vld [vmem:[#allocation2] sm:$0xff]  ;;  %v410_v10 = vld [vmem:[%s4156_s15 + $0x8] sm:$0xff]  ;;  %vm656_vm3 = vcmask 64512   ;;  %vm3123_vm4 = vcmask 523264   ;;  %p3993_p5 = scmp.eq.s32.totalorder %s4142_s28, 1 }
  0x17   : > { %v3867_v8 = vpack.c.bf16 %v408_v6, %v407_v4  ;;  %3609 = vmatprep.mubr.msk.f32.mxu1 %vm418_vm1, %v4189_v7  ;;  %v409_v9 = vld [vmem:[%s4156_s15] sm:$0xff]  ;;  %v414_v13 = vld [vmem:[%s4161_s18 + $0x8] sm:$0xff]  ;;  %v415_v14 = vld [vmem:[%s4161_s18 + $0x10] sm:$0xff] }
  0x18   : > { %3864 = vmatprep.subr.bf16.mxu1 %v3863_v5  ;;  %v4198_v11 = vld [vmem:[%s4459_s1] sm:$0xff]  ;;  %v3871_v15 = vpack.c.bf16 %v410_v10, %v409_v9  ;;  %v416_v17 = vld [vmem:[%s4161_s18 + $0x18] sm:$0xff]  ;;  %v411_v18 = vld [vmem:[%s4156_s15 + $0x10] sm:$0xff] }
  0x19   : > { %3866 = vmatpush3.bf16.msra.mxu1 %v3863_v5  ;;  %v413_v12 = vld [vmem:[%s4161_s18] sm:$0xff]  ;;  %3631 = vmatprep.mubr.msk.f32.mxu0 %vm418_vm1, %v4198_v11  ;;  %v412_v19 = vld [vmem:[%s4156_s15 + $0x18] sm:$0xff]  ;;  %v3883_v20 = vpack.c.bf16 %v416_v17, %v415_v14  ;;  %v4208_v21 = vld [vmem:[#allocation2 + $0x8] sm:$0xff] }
  0x1a   : > { %3868 = vmatprep.subr.bf16.mxu1 %v3867_v8  ;;  %v3879_v16 = vpack.c.bf16 %v414_v13, %v413_v12  ;;  %v3875_v22 = vpack.c.bf16 %v412_v19, %v411_v18  ;;  %v4217_v23 = vld [vmem:[%s4459_s1 + $0x8] sm:$0xff]  ;;  %v3372_v49 = vld [vmem:[%s4151_s12 + $0x20] sm:$0xff]  ;;  %v3374_v52 = vld [vmem:[%s4151_s12 + $0x30] sm:$0xff] }
  0x1b   : > { %v3373_v50 = vld [vmem:[%s4151_s12 + $0x28] sm:$0xff]  ;;  %v3375_v53 = vld [vmem:[%s4151_s12 + $0x38] sm:$0xff]  ;;  %v3380_v55 = vld [vmem:[%s4161_s18 + $0x20] sm:$0xff] }
  0x1c   : > { %3880 = vmatprep.subr.bf16.mxu0 %v3879_v16  ;;  %v3887_v51 = vpack.c.bf16 %v3373_v50, %v3372_v49  ;;  %v3891_v54 = vpack.c.bf16 %v3375_v53, %v3374_v52  ;;  %v3381_v56 = vld [vmem:[%s4161_s18 + $0x28] sm:$0xff]  ;;  %v3376_v60 = vld [vmem:[%s4156_s15 + $0x20] sm:$0xff]  ;;  %v3378_v1 = vld [vmem:[%s4156_s15 + $0x30] sm:$0xff] }
  0x1d   : > { %3870 = vmatpush3.bf16.msra.mxu1 %v3867_v8  ;;  %3882 = vmatpush3.bf16.msra.mxu0 %v3879_v16  ;;  %v3903_v57 = vpack.c.bf16 %v3381_v56, %v3380_v55  ;;  %v3377_v61 = vld [vmem:[%s4156_s15 + $0x28] sm:$0xff]  ;;  %v3379_v2 = vld [vmem:[%s4156_s15 + $0x38] sm:$0xff]  ;;  %v3382_v6 = vld [vmem:[%s4161_s18 + $0x30] sm:$0xff] }
  0x1e   : > { %3872 = vmatprep.subr.bf16.mxu1 %v3871_v15  ;;  %3884 = vmatprep.subr.bf16.mxu0 %v3883_v20  ;;  %v3895_v0 = vpack.c.bf16 %v3377_v61, %v3376_v60  ;;  %v3899_v5 = vpack.c.bf16 %v3379_v2, %v3378_v1  ;;  %v3383_v8 = vld [vmem:[%s4161_s18 + $0x38] sm:$0xff]  ;;  %v417_v49 = vld [vmem:[%s4166_s21] sm:$0xff]  ;;  %v3403_v53 = vld [vmem:[%s4151_s12 + $0x50] sm:$0xff] }
  0x1f   : > { %v3907_v9 = vpack.c.bf16 %v3383_v8, %v3382_v6  ;;  %v3401_v50 = vld [vmem:[%s4151_s12 + $0x40] sm:$0xff]  ;;  %v3410_v8 = vld [vmem:[%s4161_s18 + $0x48] sm:$0xff] }
  0x20   : > { %3610 = vmatmul.mubr.msk.f32.vlgmr.msra.gmra.mrb[0].mxu1 %vm418_vm1, %v4208_v21  ;;  %v3409_v6 = vld [vmem:[%s4161_s18 + $0x40] sm:$0xff] }
  0x21   : > { %3874 = vmatpush3.bf16.msra.mxu1 %v3871_v15  ;;  %3620 = vmatprep.mubr.msk.f32.mxu1 %vm418_vm1, %v4198_v11 }
  0x22   : > { %3876 = vmatprep.subr.bf16.mxu1 %v3875_v22  ;;  %3886 = vmatpush3.bf16.msra.mxu0 %v3883_v20 }
  0x23   : > { %3644 = vmatprep.subr.mxu0 %v4086_v24 }
  0x25   : > { %3878 = vmatpush3.bf16.msra.mxu1 %v3875_v22  ;;  %3632 = vmatmul.mubr.msk.f32.vlgmr.msra.gmra.mrb[0].mxu0 %vm418_vm1, %v4217_v23 }
  0x26   : > { %3634 = vmatprep.subr.mxu1 %v4086_v24  ;;  %3646 = vmatprep.mubr.msk.f32.mxu0 %vm4087_vm2, %v4086_v24 }
  0x28   : > { %3621 = vmatmul.mubr.msk.f32.vlgmr.msra.gmra.mrb[2].mxu1 %vm418_vm1, %v4217_v23 }
  0x29   : > { %3636 = vmatprep.mubr.msk.f32.mxu1 %vm4087_vm2, %v4086_v24 }
  0xf3   : > { %v3611_v25 = vpop.f32.mrb[0].mxu1 }
  0xf4   : > { %v491_v26 = vpop.f32.mrb[1].mxu1 }
  0xf8   : > { %v4229_v27 = vpop.f32.mrb[0].mxu0 }
  0xf9   : > { %v647_v28 = vpop.f32.mrb[1].mxu0 }
  0xfb   : > { %v3622_v29 = vpop.f32.mrb[2].mxu1 }
  0xfc   : > { %v572_v30 = vpop.f32.mrb[3].mxu1  ;;  %3645 = vmatpush3.xpose.msk.msra.mxu0 %vm656_vm3, %v3622_v29 }
  0xfd   : > { %3635 = vmatpush3.xpose.msk.msra.mxu1 %vm656_vm3, %v572_v30  ;;  %3888 = vmatprep.subr.bf16.mxu0 %v3887_v51 }
  0xfe   : > { %3639 = vmatprep.subr.mxu1 %v4086_v24 }
  0xff   : > { %3647 = vmatmul.mubr.msk.f32.vlgmr.msra.gmra.mrb[2].mxu0 %vm656_vm3, %v3611_v25 }
 0x100   : > { %3637 = vmatmul.mubr.msk.f32.vlgmr.msra.gmra.mrb[4].mxu1 %vm656_vm3, %v491_v26  ;;  %3662 = vmatprep.mubr.msk.f32.mxu0 %vm418_vm1, %v4189_v7 }
 0x101   : > { %3640 = vmatpush3.msra.mxu1 %v647_v28  ;;  %3641 = vmatprep.mubr.msk.f32.mxu1 %vm4087_vm2, %v4086_v24 }
 0x102   : > { %3649 = vmatprep.subr.mxu1 %v4086_v24  ;;  %3890 = vmatpush3.bf16.msra.mxu0 %v3887_v51  ;;  %v3402_v51 = vld [vmem:[%s4151_s12 + $0x48] sm:$0xff] }
 0x103   : > { %3892 = vmatprep.subr.bf16.mxu0 %v3891_v54  ;;  %v3911_v52 = vpack.c.bf16 %v3402_v51, %v3401_v50  ;;  %v3430_v50 = vld [vmem:[%s4151_s12 + $0x70] sm:$0xff]  ;;  %v3431_v51 = vld [vmem:[%s4151_s12 + $0x78] sm:$0xff] }
 0x106   : > { %3894 = vmatpush3.bf16.msra.mxu0 %v3891_v54  ;;  %v3404_v54 = vld [vmem:[%s4151_s12 + $0x58] sm:$0xff] }
 0x107   : > { %3904 = vmatprep.subr.bf16.mxu0 %v3903_v57  ;;  %v3915_v55 = vpack.c.bf16 %v3404_v54, %v3403_v53  ;;  %v3436_v53 = vld [vmem:[%s4161_s18 + $0x60] sm:$0xff]  ;;  %v3437_v54 = vld [vmem:[%s4161_s18 + $0x68] sm:$0xff] }
 0x109   : > { %3663 = vmatmul.mubr.msk.f32.vlgmr.msra.gmra.mrb[4].mxu0 %vm418_vm1, %v4208_v21 }
 0x10a   : > { %3684 = vmatprep.mubr.msk.f32.mxu0 %vm418_vm1, %v4198_v11  ;;  %3906 = vmatpush3.bf16.msra.mxu0 %v3903_v57  ;;  %v3405_v57 = vld [vmem:[%s4156_s15 + $0x40] sm:$0xff] }
 0x10b   : > { %3908 = vmatprep.subr.bf16.mxu0 %v3907_v9 }
 0x10e   : > { %3910 = vmatpush3.bf16.msra.mxu0 %v3907_v9  ;;  %v3411_v9 = vld [vmem:[%s4161_s18 + $0x50] sm:$0xff] }
 0x10f   : > { %3697 = vmatprep.subr.mxu0 %v4086_v24 }
 0x111   : > { %3685 = vmatmul.mubr.msk.f32.vlgmr.msra.gmra.mrb[6].mxu0 %vm418_vm1, %v4217_v23 }
 0x112   : > { %3699 = vmatprep.mubr.msk.f32.mxu0 %vm4087_vm2, %v4086_v24 }
 0x1d2   : > { %v890_v31 = vpop.f32.mrb[2].mxu0 }
 0x1d3   : > { %v729_v32 = vpop.f32.mrb[4].mxu1  ;;  %v3648_v33 = vpop.f32.mrb[3].mxu0  ;;  %v894_v36 = vmul.f32 0.35355338, %v890_v31 }
 0x1d4   : > { %v733_v34 = vmul.f32 0.35355338, %v729_v32  ;;  %v3638_v35 = vpop.f32.mrb[5].mxu1 }
 0x1d5   : > { %v895_v38 = vsel %vm656_vm3, %v894_v36, -inf }
 0x1d6   : > { %v734_v37 = vsel %vm656_vm3, %v733_v34, -inf }
 0x1d7   : > { %735 = vmax.xlane.f32.xlu0 %v734_v37 }
 0x1db   : > { %896 = vmax.xlane.f32.xlu0 %v895_v38 }
 0x1dc   : > { %v3664_v10 = vpop.f32.mrb[4].mxu0 }
 0x1dd   : > { %v1062_v12 = vpop.f32.mrb[5].mxu0 }
 0x1e4   : > { %v3686_v19 = vpop.f32.mrb[6].mxu0 }
 0x1e5   : > { %v1212_v20 = vpop.f32.mrb[7].mxu0 }
 0x264   : > { %v736_v39 = vpop.xlane.xlu0 %735 }
 0x265   : > { %v737_v40 = vsub.f32 %v733_v34, %v736_v39 }
 0x267   : > { %v738_v41 = vmul.f32 1.442695, %v737_v40 }
 0x268   : > { %v897_v42 = vpop.xlane.xlu0 %896 }
 0x269   : > { %4008 = vpow2.f32 %v738_v41  ;;  %v898_v43 = vsub.f32 %v894_v36, %v897_v42 }
 0x26b   : > { %v899_v44 = vmul.f32 1.442695, %v898_v43 }
 0x26d   : > { %4010 = vpow2.f32 %v899_v44 }
 0x273   : > { %v4009_v45 = vpop.eup %4008 }
 0x274   : > { %v740_v46 = vsel %vm656_vm3, %v4009_v45, 0.0 }
 0x275   : > { %741 = vadd.xlane.f32.xlu1 %v740_v46 }
 0x277   : > { %v4011_v47 = vpop.eup %4010 }
 0x278   : > { %v901_v48 = vsel %vm656_vm3, %v4011_v47, 0.0 }
 0x279   : > { %902 = vadd.xlane.f32.xlu1 %v901_v48  ;;  %v3384_v48 = vld [vmem:[%s4166_s21 + $0x8] sm:$0xff] }
 0x302   : > { %v742_v58 = vpop.xlane.xlu1 %741 }
 0x303   : > { %4012 = vrcp.f32 %v742_v58  ;;  %v3406_v58 = vld [vmem:[%s4156_s15 + $0x48] sm:$0xff] }
 0x304   : > { %v3919_v60 = vpack.c.bf16 %v3406_v58, %v3405_v57  ;;  %v3439_v57 = vld [vmem:[%s4161_s18 + $0x78] sm:$0xff] }
 0x306   : > { %v903_v59 = vpop.xlane.xlu1 %902 }
 0x307   : > { %4014 = vrcp.f32 %v903_v59 }
 0x30d   : > { %v4013_v62 = vpop.eup %4012 }
 0x30e   : > { %v744_v63 = vmul.f32 %v4013_v62, %v4009_v45 }
 0x310   : > { %3642 = vmatmul.mubr.msk.f32.vlgmr.msra.gmra.mrb[6].mxu1 %vm656_vm3, %v744_v63  ;;  %v3407_v63 = vld [vmem:[%s4156_s15 + $0x50] sm:$0xff] }
 0x311   : > { %v4015_v3 = vpop.eup %4014  ;;  %3650 = vmatpush3.msra.mxu1 %v4229_v27  ;;  %3651 = vmatprep.mubr.msk.f32.mxu1 %vm4087_vm2, %v4086_v24 }
 0x312   : > { %v905_v4 = vmul.f32 %v4015_v3, %v4011_v47  ;;  %3896 = vmatprep.subr.bf16.mxu1 %v3895_v0 }
 0x314   : > { %3652 = vmatmul.mubr.msk.f32.vlgmr.msra.gmra.mrb[8].mxu1 %vm656_vm3, %v905_v4 }
 0x315   : > { %3898 = vmatpush3.bf16.msra.mxu1 %v3895_v0  ;;  %3673 = vmatprep.mubr.msk.f32.mxu1 %vm418_vm1, %v4198_v11  ;;  %v3408_v0 = vld [vmem:[%s4156_s15 + $0x58] sm:$0xff] }
 0x316   : > { %3900 = vmatprep.subr.bf16.mxu1 %v3899_v5  ;;  %v3923_v1 = vpack.c.bf16 %v3408_v0, %v3407_v63 }
 0x319   : > { %3902 = vmatpush3.bf16.msra.mxu1 %v3899_v5 }
 0x31a   : > { %3687 = vmatprep.subr.mxu1 %v4086_v24 }
 0x31c   : > { %3674 = vmatmul.mubr.msk.f32.vlgmr.msra.gmra.mrb[10].mxu1 %vm418_vm1, %v4217_v23 }
 0x31d   : > { %3689 = vmatprep.mubr.msk.f32.mxu1 %vm4087_vm2, %v4086_v24 }
 0x3e3   : > { %v4278_v13 = vpop.f32.mrb[6].mxu1 }
 0x3e4   : > { %v3643_v14 = vpop.f32.mrb[7].mxu1 }
 0x3e7   : > { %v4280_v15 = vpop.f32.mrb[8].mxu1 }
 0x3e8   : > { %v3653_v16 = vpop.f32.mrb[9].mxu1 }
 0x3ef   : > { %v3675_v17 = vpop.f32.mrb[10].mxu1 }
 0x3f0   : > { %v1137_v18 = vpop.f32.mrb[11].mxu1  ;;  %3698 = vmatpush3.xpose.msk.msra.mxu0 %vm656_vm3, %v3675_v17 }
 0x3f1   : > { %3688 = vmatpush3.xpose.msk.msra.mxu1 %vm656_vm3, %v1137_v18  ;;  %3707 = vmatprep.subr.mxu0 %v3384_v48 }
 0x3f2   : > { %3692 = vmatprep.subr.mxu1 %v4086_v24 }
 0x3f3   : > { %3700 = vmatmul.mubr.msk.f32.vlgmr.msra.gmra.mrb[8].mxu0 %vm656_vm3, %v3664_v10  ;;  %v3927_v10 = vpack.c.bf16 %v3410_v8, %v3409_v6 }
 0x3f4   : > { %3690 = vmatmul.mubr.msk.f32.vlgmr.msra.gmra.mrb[12].mxu1 %vm656_vm3, %v1062_v12  ;;  %3708 = vmatpush3.msra.mxu0 %v3384_v48  ;;  %v3412_v12 = vld [vmem:[%s4161_s18 + $0x58] sm:$0xff]  ;;  %v3429_v48 = vld [vmem:[%s4151_s12 + $0x68] sm:$0xff] }
 0x3f5   : > { %3694 = vmatprep.mubr.msk.f32.mxu1 %vm4087_vm2, %v4086_v24  ;;  %3693 = vmatpush3.msra.mxu1 %v1212_v20 }
 0x3f6   : > { %3702 = vmatprep.subr.mxu1 %v4086_v24  ;;  %3712 = vmatprep.subr.mxu0 %v417_v49 }
 0x4c6   : > { %v1454_v22 = vpop.f32.mrb[8].mxu0 }
 0x4c7   : > { %v1458_v25 = vmul.f32 0.35355338, %v1454_v22  ;;  %v1293_v26 = vpop.f32.mrb[12].mxu1  ;;  %v3701_v27 = vpop.f32.mrb[9].mxu0 }
 0x4c8   : > { %v1297_v28 = vmul.f32 0.35355338, %v1293_v26  ;;  %v3691_v29 = vpop.f32.mrb[13].mxu1 }
 0x4c9   : > { %v1459_v30 = vsel %vm656_vm3, %v1458_v25, -inf }
 0x4ca   : > { %1460 = vmax.xlane.f32.xlu1 %v1459_v30  ;;  %v1298_v31 = vsel %vm656_vm3, %v1297_v28, -inf }
 0x4cb   : > { %1299 = vmax.xlane.f32.xlu0 %v1298_v31 }
 0x557   : > { %v1461_v32 = vpop.xlane.xlu1 %1460 }
 0x558   : > { %v1462_v33 = vsub.f32 %v1458_v25, %v1461_v32  ;;  %v1300_v34 = vpop.xlane.xlu0 %1299 }
 0x559   : > { %v1301_v35 = vsub.f32 %v1297_v28, %v1300_v34 }
 0x55a   : > { %v1463_v36 = vmul.f32 1.442695, %v1462_v33 }
 0x55b   : > { %v1302_v37 = vmul.f32 1.442695, %v1301_v35 }
 0x55c   : > { %4016 = vpow2.f32 %v1463_v36 }
 0x55d   : > { %4018 = vpow2.f32 %v1302_v37 }
 0x566   : > { %v4017_v38 = vpop.eup %4016 }
 0x567   : > { %v4019_v39 = vpop.eup %4018  ;;  %v1465_v40 = vsel %vm656_vm3, %v4017_v38, 0.0 }
 0x568   : > { %1466 = vadd.xlane.f32.xlu1 %v1465_v40  ;;  %v1304_v41 = vsel %vm656_vm3, %v4019_v39, 0.0 }
 0x569   : > { %1305 = vadd.xlane.f32.xlu0 %v1304_v41 }
 0x5f5   : > { %v1467_v42 = vpop.xlane.xlu1 %1466 }
 0x5f6   : > { %v1306_v43 = vpop.xlane.xlu0 %1305 }
 0x5f7   : > { %4020 = vrcp.f32 %v1306_v43  ;;  %v3413_v43 = vld [vmem:[%s4166_s21 + $0x10] sm:$0xff] }
 0x5f8   : > { %4022 = vrcp.f32 %v1467_v42 }
 0x601   : > { %v4021_v44 = vpop.eup %4020 }
 0x602   : > { %v1308_v45 = vmul.f32 %v4021_v44, %v4019_v39  ;;  %v4023_v46 = vpop.eup %4022  ;;  %v3432_v44 = vld [vmem:[%s4156_s15 + $0x60] sm:$0xff] }
 0x603   : > { %v1469_v47 = vmul.f32 %v4023_v46, %v4017_v38 }
 0x604   : > { %3695 = vmatmul.mubr.msk.f32.vlgmr.msra.gmra.mrb[14].mxu1 %vm656_vm3, %v1308_v45  ;;  %v3433_v45 = vld [vmem:[%s4156_s15 + $0x68] sm:$0xff] }
 0x605   : > { %3703 = vmatpush3.msra.mxu1 %v3686_v19  ;;  %3704 = vmatprep.mubr.msk.f32.mxu1 %vm4087_vm2, %v4086_v24  ;;  %v3943_v46 = vpack.c.bf16 %v3433_v45, %v3432_v44 }
 0x606   : > { %3912 = vmatprep.subr.bf16.mxu1 %v3911_v52 }
 0x608   : > { %3705 = vmatmul.mubr.msk.f32.vlgmr.msra.gmra.mrb[16].mxu1 %vm656_vm3, %v1469_v47  ;;  %v3428_v47 = vld [vmem:[%s4151_s12 + $0x60] sm:$0xff]  ;;  %s4088_s12 = smov [#allocation3]  }
 0x609   : > { %3725 = vmatprep.mubr.msk.f32.mxu1 %vm418_vm1, %v4189_v7  ;;  %3914 = vmatpush3.bf16.msra.mxu1 %v3911_v52  ;;  %v3939_v52 = vpack.c.bf16 %v3431_v51, %v3430_v50 }
 0x60a   : > { %3916 = vmatprep.subr.bf16.mxu1 %v3915_v55 }
 0x60d   : > { %3918 = vmatpush3.bf16.msra.mxu1 %v3915_v55  ;;  %v3438_v55 = vld [vmem:[%s4161_s18 + $0x70] sm:$0xff] }
 0x60e   : > { %3928 = vmatprep.subr.bf16.mxu1 %v3927_v10  ;;  %v3955_v58 = vpack.c.bf16 %v3439_v57, %v3438_v55  ;;  %v3030_v55 = vld [vmem:[%s4171_s24 + $0x10] sm:$0xff]  ;;  %v3031_v57 = vld [vmem:[%s4171_s24 + $0x18] sm:$0xff] }
 0x610   : > { %3726 = vmatmul.mubr.msk.f32.vlgmr.msra.gmra.mrb[18].mxu1 %vm418_vm1, %v4208_v21 }
 0x611   : > { %3747 = vmatprep.mubr.msk.f32.mxu1 %vm418_vm1, %v4198_v11  ;;  %3930 = vmatpush3.bf16.msra.mxu1 %v3927_v10 }
 0x6d7   : > { %v1378_v56 = vpop.f32.mrb[14].mxu1 }
 0x6d8   : > { %v3696_v59 = vpop.f32.mrb[15].mxu1  ;;  %3709 = vmatprep.mubr.msk.f32.mxu0 %vm656_vm3, %v1378_v56  ;;  %v3951_v56 = vpack.c.bf16 %v3437_v54, %v3436_v53  ;;  %v3028_v53 = vld [vmem:[%s4171_s24] sm:$0xff]  ;;  %v3029_v54 = vld [vmem:[%s4171_s24 + $0x8] sm:$0xff] }
 0x6db   : > { %v1539_v61 = vpop.f32.mrb[16].mxu1 }
 0x6dc   : > { %v3706_v62 = vpop.f32.mrb[17].mxu1  ;;  %3710 = vmatmul.mubr.msk.f32.vlgmr.msra.gmra.mrb[10].mxu0 %vm656_vm3, %v1539_v61  ;;  %v3435_v61 = vld [vmem:[%s4156_s15 + $0x78] sm:$0xff] }
 0x6dd   : > { %3713 = vmatpush3.msra.mxu0 %v417_v49  ;;  %3714 = vmatprep.mubr.msk.f32.mxu0 %vm656_vm3, %v4278_v13  ;;  %v3931_v13 = vpack.c.bf16 %v3412_v12, %v3411_v9  ;;  %v3935_v49 = vpack.c.bf16 %v3429_v48, %v3428_v47 }
 0x6de   : > { %3920 = vmatprep.subr.bf16.mxu0 %v3919_v60 }
 0x6df   : > { %3932 = vmatprep.subr.bf16.mxu1 %v3931_v13 }
 0x6e0   : > { %3934 = vmatpush3.bf16.msra.mxu1 %v3931_v13 }
 0x6e1   : > { %3755 = vmatprep.subr.mxu1 %v4086_v24 }
 0x6e3   : > { %v3727_v2 = vpop.f32.mrb[18].mxu1  ;;  %3748 = vmatmul.mubr.msk.f32.vlgmr.msra.gmra.mrb[20].mxu1 %vm418_vm1, %v4217_v23 }
 0x6e4   : > { %3715 = vmatmul.mubr.msk.f32.vlgmr.msra.gmra.mrb[10].mxu0 %vm656_vm3, %v4280_v15  ;;  %v1788_v3 = vpop.f32.mrb[19].mxu1  ;;  %3757 = vmatprep.mubr.msk.f32.mxu1 %vm4087_vm2, %v4086_v24 }
 0x6e5   : > { %3922 = vmatpush3.bf16.msra.mxu0 %v3919_v60  ;;  %3736 = vmatprep.mubr.msk.f32.mxu0 %vm418_vm1, %v4198_v11  ;;  %v3434_v60 = vld [vmem:[%s4156_s15 + $0x70] sm:$0xff]  ;;  %s3241_s15 = sshll.u32 %s4088_s12, 4  ;;  %s3242_s15 = int_to_ptr.vmem [resolvable:$true] %s3241_s15 }
 0x6e6   : > { %3924 = vmatprep.subr.bf16.mxu0 %v3923_v1  ;;  %v3947_v63 = vpack.c.bf16 %v3435_v61, %v3434_v60  ;;  %v3116_v60 = vld [vmem:[%s4176_s11 + $0x8] sm:$0xff]  ;;  %v3117_v61 = vld [vmem:[%s4176_s11 + $0x10] sm:$0xff]  ;;  %s4048_s18 = scalar_lea.vmem %s3242_s15, 256  ;;  %p4055_p9 = scmp.lt.s32.totalorder %s3242_s15, %s3242_s15 }
 0x6e7   : > { %p4049_p6 = scmp.ne.s32.totalorder %s3242_s15, %s4048_s18  ;;  %p4056_p10 = scmp.lt.s32.totalorder %s4048_s18, %s4048_s18 }
 0x6e9   : > { %3926 = vmatpush3.bf16.msra.mxu0 %v3923_v1  ;;  %p4050_p7 = pnand %p4049_p6, %p3993_p5  ;;  %p4057_p11 = por %p4056_p10, %p4055_p9 }
 0x6ea   : > { %3750 = vmatprep.subr.mxu0 %v4086_v24 }
 0x6eb   : > { %p4051_p8 = pneg %p4050_p7 }
 0x6ec   : > { %3737 = vmatmul.mubr.msk.f32.vlgmr.msra.gmra.mrb[12].mxu0 %vm418_vm1, %v4217_v23 }
 0x6ed   : > { %3752 = vmatprep.mubr.msk.f32.mxu0 %vm4087_vm2, %v4086_v24  ;;  %p4058_p12 = pnand %p4057_p11, %p4051_p8 }
 0x7b6   : > { %v3749_v35 = vpop.f32.mrb[20].mxu1 }
 0x7b7   : > { %v1938_v36 = vpop.f32.mrb[21].mxu1 }
 0x7b8   : > { %3756 = vmatpush3.msra.mxu1 %v1938_v36 }
 0x7b9   : > { %3765 = vmatprep.subr.mxu1 %v4086_v24 }
 0x7bf   : > { %v3738_v4 = vpop.f32.mrb[12].mxu0 }
 0x7c0   : > { %v1863_v5 = vpop.f32.mrb[13].mxu0 }
 0x7c1   : > { %3751 = vmatpush3.xpose.msk.msra.mxu0 %vm656_vm3, %v1863_v5 }
 0x7c2   : > { %3760 = vmatprep.subr.mxu0 %v4086_v24 }
 0x7c4   : > { %3753 = vmatmul.mubr.msk.f32.vlgmr.msra.gmra.mrb[14].mxu0 %vm656_vm3, %v1788_v3 }
 0x7c5   : > { %3761 = vmatpush3.xpose.msk.msra.mxu0 %vm656_vm3, %v3738_v4  ;;  %3762 = vmatprep.mubr.msk.f32.mxu0 %vm4087_vm2, %v4086_v24 }
 0x7c6   : > { %3770 = vmatprep.subr.mxu0 %v3413_v43 }
 0x7c8   : > { %3763 = vmatmul.mubr.msk.f32.vlgmr.msra.gmra.mrb[16].mxu0 %vm656_vm3, %v3727_v2 }
 0x7c9   : > { %3771 = vmatpush3.msra.mxu0 %v3413_v43 }
 0x7ca   : > { %3944 = vmatprep.subr.bf16.mxu0 %v3943_v46 }
 0x897   : > { %v2019_v14 = vpop.f32.mrb[14].mxu0 }
 0x898   : > { %v2023_v15 = vmul.f32 0.35355338, %v2019_v14  ;;  %v3754_v16 = vpop.f32.mrb[15].mxu0 }
 0x89a   : > { %v2024_v17 = vsel %vm656_vm3, %v2023_v15, -inf }
 0x89b   : > { %2025 = vmax.xlane.f32.xlu0 %v2024_v17  ;;  %v2180_v18 = vpop.f32.mrb[16].mxu0 }
 0x89c   : > { %v2184_v19 = vmul.f32 0.35355338, %v2180_v18  ;;  %v3764_v20 = vpop.f32.mrb[17].mxu0 }
 0x89e   : > { %v2185_v22 = vsel %vm656_vm3, %v2184_v19, -inf }
 0x89f   : > { %2186 = vmax.xlane.f32.xlu1 %v2185_v22 }
 0x928   : > { %v2026_v25 = vpop.xlane.xlu0 %2025 }
 0x929   : > { %v2027_v26 = vsub.f32 %v2023_v15, %v2026_v25 }
 0x92b   : > { %v2028_v27 = vmul.f32 1.442695, %v2027_v26 }
 0x92c   : > { %v2187_v28 = vpop.xlane.xlu1 %2186 }
 0x92d   : > { %4024 = vpow2.f32 %v2028_v27  ;;  %v2188_v29 = vsub.f32 %v2184_v19, %v2187_v28 }
 0x92f   : > { %v2189_v30 = vmul.f32 1.442695, %v2188_v29 }
 0x931   : > { %4026 = vpow2.f32 %v2189_v30 }
 0x937   : > { %v4025_v31 = vpop.eup %4024 }
 0x938   : > { %v2030_v32 = vsel %vm656_vm3, %v4025_v31, 0.0 }
 0x939   : > { %2031 = vadd.xlane.f32.xlu0 %v2030_v32 }
 0x93b   : > { %v4027_v33 = vpop.eup %4026 }
 0x93c   : > { %v2191_v34 = vsel %vm656_vm3, %v4027_v33, 0.0 }
 0x93d   : > { %2192 = vadd.xlane.f32.xlu1 %v2191_v34 }
 0x9c6   : > { %v2032_v37 = vpop.xlane.xlu0 %2031 }
 0x9c7   : > { %4028 = vrcp.f32 %v2032_v37 }
 0x9ca   : > { %v2193_v38 = vpop.xlane.xlu1 %2192 }
 0x9cb   : > { %4030 = vrcp.f32 %v2193_v38 }
 0x9d1   : > { %v4029_v39 = vpop.eup %4028 }
 0x9d2   : > { %v2034_v40 = vmul.f32 %v4029_v39, %v4025_v31 }
 0x9d4   : > { %3758 = vmatmul.mubr.msk.f32.vlgmr.msra.gmra.mrb[22].mxu1 %vm656_vm3, %v2034_v40 }
 0x9d5   : > { %v4031_v41 = vpop.eup %4030  ;;  %3766 = vmatpush3.msra.mxu1 %v3749_v35  ;;  %3767 = vmatprep.mubr.msk.f32.mxu1 %vm4087_vm2, %v4086_v24  ;;  %v3440_v35 = vld [vmem:[%s4166_s21 + $0x18] sm:$0xff] }
 0x9d6   : > { %v2195_v42 = vmul.f32 %v4031_v41, %v4027_v33  ;;  %3936 = vmatprep.subr.bf16.mxu1 %v3935_v49 }
 0x9d8   : > { %3768 = vmatmul.mubr.msk.f32.vlgmr.msra.gmra.mrb[24].mxu1 %vm656_vm3, %v2195_v42 }
 0x9d9   : > { %3783 = vmatprep.mubr.msk.f32.mxu1 %vm418_vm1, %v4189_v7  ;;  %3938 = vmatpush3.bf16.msra.mxu1 %v3935_v49 }
 0x9da   : > { %3940 = vmatprep.subr.bf16.mxu1 %v3939_v52 }
 0x9dd   : > { %3942 = vmatpush3.bf16.msra.mxu1 %v3939_v52 }
 0x9de   : > { %3952 = vmatprep.subr.bf16.mxu1 %v3951_v56 }
 0x9e0   : > { %3784 = vmatmul.mubr.msk.f32.vlgmr.msra.gmra.mrb[26].mxu1 %vm418_vm1, %v4208_v21 }
 0x9e1   : > { %3805 = vmatprep.mubr.msk.f32.mxu1 %vm418_vm1, %v4198_v11  ;;  %3954 = vmatpush3.bf16.msra.mxu1 %v3951_v56  ;;  %v3959_v56 = vpack.c.bf16 %v3029_v54, %v3028_v53 }
 0x9e2   : > { %3956 = vmatprep.subr.bf16.mxu1 %v3955_v58 }
 0x9e5   : > { %3958 = vmatpush3.bf16.msra.mxu1 %v3955_v58  ;;  %v3963_v58 = vpack.c.bf16 %v3031_v57, %v3030_v55 }
 0x9e6   : > { %3818 = vmatprep.subr.mxu1 %v4086_v24 }
 0x9e8   : > { %3806 = vmatmul.mubr.msk.f32.vlgmr.msra.gmra.mrb[28].mxu1 %vm418_vm1, %v4217_v23 }
 0x9e9   : > { %3820 = vmatprep.mubr.msk.f32.mxu1 %vm4087_vm2, %v4086_v24 }
 0xaa7   : > { %v2104_v59 = vpop.f32.mrb[22].mxu1 }
 0xaa8   : > { %v3759_v62 = vpop.f32.mrb[23].mxu1  ;;  %3772 = vmatprep.mubr.msk.f32.mxu0 %vm656_vm3, %v2104_v59  ;;  %v3115_v59 = vld [vmem:[%s4176_s11] sm:$0xff] }
 0xaa9   : > { %v3967_v62 = vpack.c.bf16 %v3116_v60, %v3115_v59 }
 0xaab   : > { %v2265_v0 = vpop.f32.mrb[24].mxu1 }
 0xaac   : > { %v3769_v1 = vpop.f32.mrb[25].mxu1  ;;  %3773 = vmatmul.mubr.msk.f32.vlgmr.msra.gmra.mrb[10].mxu0 %vm656_vm3, %v2265_v0 }
 0xaad   : > { %3946 = vmatpush3.bf16.msra.mxu0 %v3943_v46  ;;  %3794 = vmatprep.mubr.msk.f32.mxu0 %vm418_vm1, %v4198_v11  ;;  %v3119_v1 = vld [vmem:[%s4176_s11 + $0x20] sm:$0xff] }
 0xaae   : > { %3948 = vmatprep.subr.bf16.mxu0 %v3947_v63 }
 0xab1   : > { %3950 = vmatpush3.bf16.msra.mxu0 %v3947_v63  ;;  %v3118_v63 = vld [vmem:[%s4176_s11 + $0x18] sm:$0xff] }
 0xab2   : > { %3808 = vmatprep.subr.mxu0 %v4086_v24  ;;  %v3971_v0 = vpack.c.bf16 %v3118_v63, %v3117_v61 }
 0xab3   : > { %v3785_v2 = vpop.f32.mrb[26].mxu1 }
 0xab4   : > { %3795 = vmatmul.mubr.msk.f32.vlgmr.msra.gmra.mrb[18].mxu0 %vm418_vm1, %v4217_v23  ;;  %v2435_v3 = vpop.f32.mrb[27].mxu1 }
 0xab5   : > { %3810 = vmatprep.mubr.msk.f32.mxu0 %vm4087_vm2, %v4086_v24 }
 0xabb   : > { %v3807_v4 = vpop.f32.mrb[28].mxu1 }
 0xabc   : > { %v2585_v5 = vpop.f32.mrb[29].mxu1 }
 0xb87   : > { %v3796_v6 = vpop.f32.mrb[18].mxu0 }
 0xb88   : > { %v2510_v8 = vpop.f32.mrb[19].mxu0  ;;  %3819 = vmatpush3.xpose.msk.msra.mxu1 %vm656_vm3, %v3796_v6 }
 0xb89   : > { %3809 = vmatpush3.xpose.msk.msra.mxu0 %vm656_vm3, %v2510_v8  ;;  %3960 = vmatprep.subr.bf16.mxu1 %v3959_v56 }
 0xb8a   : > { %3813 = vmatprep.subr.mxu0 %v4086_v24 }
 0xb8b   : > { %3821 = vmatmul.mubr.msk.f32.vlgmr.msra.gmra.mrb[30].mxu1 %vm656_vm3, %v3785_v2  ;;  %v3120_v2 = vld [vmem:[%s4176_s11 + $0x28] sm:$0xff] }
 0xb8c   : > { %3811 = vmatmul.mubr.msk.f32.vlgmr.msra.gmra.mrb[20].mxu0 %vm656_vm3, %v2435_v3  ;;  %3962 = vmatpush3.bf16.msra.mxu1 %v3959_v56  ;;  %v3975_v3 = vpack.c.bf16 %v3120_v2, %v3119_v1 }
 0xb8d   : > { %3814 = vmatpush3.msra.mxu0 %v2585_v5  ;;  %3815 = vmatprep.mubr.msk.f32.mxu0 %vm4087_vm2, %v4086_v24 }
 0xb8e   : > { %3823 = vmatprep.subr.mxu0 %v4086_v24  ;;  %3964 = vmatprep.subr.bf16.mxu1 %v3963_v58 }
 0xb90   : > { %3966 = vmatpush3.bf16.msra.mxu1 %v3963_v58 }
 0xc5e   : > { %v2827_v11 = vpop.f32.mrb[30].mxu1 }
 0xc5f   : > { %v2831_v23 = vmul.f32 0.35355338, %v2827_v11  ;;  %v2666_v9 = vpop.f32.mrb[20].mxu0  ;;  %v3822_v10 = vpop.f32.mrb[31].mxu1 }
 0xc60   : > { %v2670_v12 = vmul.f32 0.35355338, %v2666_v9  ;;  %v3812_v13 = vpop.f32.mrb[21].mxu0 }
 0xc61   : > { %v2832_v14 = vsel %vm656_vm3, %v2831_v23, -inf }
 0xc62   : > { %2833 = vmax.xlane.f32.xlu1 %v2832_v14  ;;  %v2671_v15 = vsel %vm656_vm3, %v2670_v12, -inf  ;;  %v3121_v14 = vld [vmem:[%s4176_s11 + $0x30] sm:$0xff] }
 0xc63   : > { %2672 = vmax.xlane.f32.xlu0 %v2671_v15  ;;  %v3122_v15 = vld [vmem:[%s4176_s11 + $0x38] sm:$0xff] }
 0xcef   : > { %v2834_v16 = vpop.xlane.xlu1 %2833 }
 0xcf0   : > { %v2835_v17 = vsub.f32 %v2831_v23, %v2834_v16  ;;  %v2673_v18 = vpop.xlane.xlu0 %2672  ;;  %v3979_v16 = vpack.c.bf16 %v3122_v15, %v3121_v14 }
 0xcf1   : > { %v2674_v19 = vsub.f32 %v2670_v12, %v2673_v18 }
 0xcf2   : > { %v2836_v20 = vmul.f32 1.442695, %v2835_v17 }
 0xcf3   : > { %v2675_v22 = vmul.f32 1.442695, %v2674_v19 }
 0xcf4   : > { %4032 = vpow2.f32 %v2836_v20 }
 0xcf5   : > { %4034 = vpow2.f32 %v2675_v22 }
 0xcfe   : > { %v4033_v25 = vpop.eup %4032 }
 0xcff   : > { %v4035_v26 = vpop.eup %4034  ;;  %v2838_v27 = vsel %vm656_vm3, %v4033_v25, 0.0 }
 0xd00   : > { %2839 = vadd.xlane.f32.xlu1 %v2838_v27  ;;  %v2677_v28 = vsel %vm656_vm3, %v4035_v26, 0.0 }
 0xd01   : > { %2678 = vadd.xlane.f32.xlu0 %v2677_v28 }
 0xd8d   : > { %v2840_v29 = vpop.xlane.xlu1 %2839 }
 0xd8e   : > { %v2679_v30 = vpop.xlane.xlu0 %2678 }
 0xd8f   : > { %4036 = vrcp.f32 %v2679_v30 }
 0xd90   : > { %4038 = vrcp.f32 %v2840_v29 }
 0xd99   : > { %v4037_v31 = vpop.eup %4036 }
 0xd9a   : > { %v2681_v32 = vmul.f32 %v4037_v31, %v4035_v26  ;;  %v4039_v33 = vpop.eup %4038 }
 0xd9b   : > { %v2842_v34 = vmul.f32 %v4039_v33, %v4033_v25 }
 0xd9c   : > { %3816 = vmatmul.mubr.msk.f32.vlgmr.msra.gmra.mrb[22].mxu0 %vm656_vm3, %v2681_v32 }
 0xd9d   : > { %3824 = vmatpush3.msra.mxu0 %v3807_v4  ;;  %3825 = vmatprep.mubr.msk.f32.mxu0 %vm4087_vm2, %v4086_v24 }
 0xd9e   : > { %3828 = vmatprep.subr.mxu0 %v3440_v35 }
 0xda0   : > { %3826 = vmatmul.mubr.msk.f32.vlgmr.msra.gmra.mrb[24].mxu0 %vm656_vm3, %v2842_v34 }
 0xda1   : > { %3829 = vmatpush3.msra.mxu0 %v3440_v35 }
 0xda2   : > { %3968 = vmatprep.subr.bf16.mxu0 %v3967_v62 }
 0xe6f   : > { %v2751_v36 = vpop.f32.mrb[22].mxu0 }
 0xe70   : > { %v3817_v37 = vpop.f32.mrb[23].mxu0  ;;  %3830 = vmatprep.mubr.msk.f32.mxu0 %vm656_vm3, %v2751_v36 }
 0xe73   : > { %v2912_v38 = vpop.f32.mrb[24].mxu0 }
 0xe74   : > { %v3827_v39 = vpop.f32.mrb[25].mxu0  ;;  %3831 = vmatmul.mubr.msk.f32.vlgmr.msra.gmra.mrb[10].mxu0 %vm656_vm3, %v2912_v38 }
 0xe75   : > { %3970 = vmatpush3.bf16.msra.mxu0 %v3967_v62 }
 0xe76   : > { %3972 = vmatprep.subr.bf16.mxu0 %v3971_v0 }
 0xe79   : > { %3974 = vmatpush3.bf16.msra.mxu0 %v3971_v0 }
 0xe7a   : > { %3976 = vmatprep.subr.bf16.mxu0 %v3975_v3 }
 0xe7d   : > { %3978 = vmatpush3.bf16.msra.mxu0 %v3975_v3 }
 0xe7e   : > { %3980 = vmatprep.subr.bf16.mxu0 %v3979_v16 }
 0xe81   : > { %3982 = vmatpush3.bf16.msra.mxu0 %v3979_v16 }
 0xf47   : > { %v3832_v40 = vpop.f32.mrb[10].mxu0 }
 0xf48   : > { %v3000_v41 = vadd.f32 %v3832_v40, %v4208_v21  ;;  %v2988_v42 = vpop.f32.mrb[11].mxu0 }
 0xf49   : > { %v2999_v24 = vadd.f32 %v2988_v42, %v4189_v7 }
 0xf4a   : > { %v3004_v43 = vsel %vm418_vm1, %v3000_v41, 0.0 }
 0xf4b   : > { %3005 = vadd.xlane.f32.xlu1 %v3004_v43  ;;  %v3001_v44 = vsel %vm418_vm1, %v2999_v24, 0.0 }
 0xf4c   : > { %3002 = vadd.xlane.f32.xlu0 %v3001_v44 }
 0xfd8   : > { %v3006_v45 = vpop.xlane.xlu1 %3005 }
 0xfd9   : > { %v3009_v46 = vmul.f32 0.03125, %v3006_v45  ;;  %v3003_v47 = vpop.xlane.xlu0 %3002 }
 0xfda   : > { %v3008_v48 = vmul.f32 0.03125, %v3003_v47 }
 0xfdb   : > { %v3011_v49 = vsub.f32 %v3000_v41, %v3009_v46 }
 0xfdc   : > { %v3010_v50 = vsub.f32 %v2999_v24, %v3008_v48 }
 0xfdd   : > { %v3013_v21 = vmul.f32 %v3011_v49, %v3011_v49 }
 0xfde   : > { %v3012_v51 = vmul.f32 %v3010_v50, %v3010_v50 }
 0xfdf   : > { %v3017_v7 = vsel %vm418_vm1, %v3013_v21, 0.0 }
 0xfe0   : > { %3018 = vadd.xlane.f32.xlu1 %v3017_v7  ;;  %v3014_v52 = vsel %vm418_vm1, %v3012_v51, 0.0 }
 0xfe1   : > { %3015 = vadd.xlane.f32.xlu0 %v3014_v52 }
0x106d   : > { %v3019_v4 = vpop.xlane.xlu1 %3018 }
0x106e   : > { %v3021_v5 = vmul.f32 0.03125, %v3019_v4  ;;  %v3016_v6 = vpop.xlane.xlu0 %3015 }
0x106f   : > { %v3020_v8 = vmul.f32 0.03125, %v3016_v6 }
0x1070   : > { %v3023_v11 = vadd.f32 1e-05, %v3021_v5 }
0x1071   : > { %v3022_v23 = vadd.f32 1e-05, %v3020_v8 }
0x1072   : > { %4040 = vrsqrt.f32 %v3023_v11 }
0x1073   : > { %4042 = vrsqrt.f32 %v3022_v23 }
0x107c   : > { %v4041_v9 = vpop.eup %4040 }
0x107d   : > { %v4043_v10 = vpop.eup %4042  ;;  %v3027_v13 = vmul.f32 %v4041_v9, %v3011_v49 }
0x107e   : > { %v3026_v12 = vmul.f32 %v4043_v10, %v3010_v50 }
0x1080   : > { %3841 = vmatprep.mubr.msk.f32.mxu1 %vm418_vm1, %v3026_v12 }
0x1081   : > { %3842 = vmatmul.mubr.msk.f32.vlgmr.msra.gmra.mrb[32].mxu1 %vm418_vm1, %v3027_v13 }
0x1154   : > { %v3843_v17 = vpop.f32.mrb[32].mxu1 }
0x1155   : > { %v3104_v18 = vpop.f32.mrb[33].mxu1  ;;  %v3114_v20 = vmax.f32 %v3843_v17, 0.0 }
0x1156   : > { %v3113_v19 = vmax.f32 %v3104_v18, 0.0 }
0x1158   : > { %3860 = vmatprep.mubr.msk.f32.mxu0 %vm3123_vm4, %v3113_v19 }
0x1159   : > { %3861 = vmatmul.mubr.msk.f32.vlgmr.msra.gmra.mrb[26].mxu0 %vm3123_vm4, %v3114_v20 }
0x122c   : > { %v3862_v22 = vpop.f32.mrb[26].mxu0 }
0x122d   : > { %v3202_v25 = vadd.f32 %v3862_v22, %v3027_v13  ;;  %v3196_v26 = vpop.f32.mrb[27].mxu0 }
0x122e   : > { %v3197_v27 = vadd.f32 %v3196_v26, %v3026_v12 }
0x122f   : > { %v3208_v28 = vsel %vm418_vm1, %v3202_v25, 0.0 }
0x1230   : > { %3209 = vadd.xlane.f32.xlu1 %v3208_v28  ;;  %v3205_v29 = vsel %vm418_vm1, %v3197_v27, 0.0 }
0x1231   : > { %3206 = vadd.xlane.f32.xlu0 %v3205_v29 }
0x12bd   : > { %v3210_v30 = vpop.xlane.xlu1 %3209 }
0x12be   : > { %v3212_v31 = vmul.f32 0.03125, %v3210_v30  ;;  %v3207_v32 = vpop.xlane.xlu0 %3206 }
0x12bf   : > { %v3211_v33 = vmul.f32 0.03125, %v3207_v32 }
0x12c0   : > { %v3214_v34 = vsub.f32 %v3202_v25, %v3212_v31 }
0x12c1   : > { %v3213_v35 = vsub.f32 %v3197_v27, %v3211_v33 }
0x12c2   : > { %v3216_v36 = vmul.f32 %v3214_v34, %v3214_v34 }
0x12c3   : > { %v3215_v37 = vmul.f32 %v3213_v35, %v3213_v35 }
0x12c4   : > { %v3220_v38 = vsel %vm418_vm1, %v3216_v36, 0.0 }
0x12c5   : > { %3221 = vadd.xlane.f32.xlu1 %v3220_v38  ;;  %v3217_v39 = vsel %vm418_vm1, %v3215_v37, 0.0 }
0x12c6   : > { %3218 = vadd.xlane.f32.xlu0 %v3217_v39 }
0x1352   : > { %v3222_v40 = vpop.xlane.xlu1 %3221 }
0x1353   : > { %v3224_v41 = vmul.f32 0.03125, %v3222_v40  ;;  %v3219_v42 = vpop.xlane.xlu0 %3218 }
0x1354   : > { %v3223_v24 = vmul.f32 0.03125, %v3219_v42 }
0x1355   : > { %v3226_v43 = vadd.f32 1e-05, %v3224_v41 }
0x1356   : > { %v3225_v44 = vadd.f32 1e-05, %v3223_v24 }
0x1357   : > { %4044 = vrsqrt.f32 %v3226_v43 }
0x1358   : > { %4046 = vrsqrt.f32 %v3225_v44 }
0x1361   : > { %v4045_v45 = vpop.eup %4044 }
0x1362   : > { %v4047_v46 = vpop.eup %4046  ;;  %v3230_v47 = vmul.f32 %v4045_v45, %v3214_v34 }
0x1363   : > { %v3229_v48 = vmul.f32 %v4047_v46, %v3213_v35 }
0x1364   : > { %3232 = vst.msk [vmem:[#allocation2 + $0x8] sm:$0xff] %vm418_vm1, %v3230_v47  ;;  %3234 = vst.msk [vmem:[#allocation3 + $0x8] sm:$0xff] %vm418_vm1, %v3230_v47 }
0x1365   : > { %3231 = vst.msk [vmem:[#allocation2] sm:$0xff] %vm418_vm1, %v3229_v48  ;;  %3233 = vst.msk [vmem:[#allocation3] sm:$0xff] %vm418_vm1, %v3229_v48 }
0x1366   : > { %4061 = shalt.err (!%p4058_p12)
}
0x1367   : > { %s4062_s22 = scalar_lea.hbm %s4466_s8, 256 }
0x1368   : > { %p4063_p13 = scmp.ne.s32.totalorder %s4466_s8, %s4062_s22  ;;  %p4068_p2 = scmp.lt.u32.totalorder %s4062_s22, %s4466_s8 }
0x136a   : > { %p4064_p0 = pnand %p4063_p13, %p3993_p5 }
0x136c   : > { %p4065_p1 = pneg %p4064_p0 }
0x136e   : > { %p4070_p3 = pnand %p4068_p2, %p4065_p1 }
0x1370   : > { %4073 = shalt.err (!%p4070_p3)
}
0x1371   : > { %s4089_s10 = smov 128   ;;  %s4090_s11 = smov 8  }
0x1372   : > { %3990 = dma.vmem_to_hbm [thread:$0]  (%p3993_p5), %s3242_s15, 256, %s4466_s8, [#allocation4], %s4089_s10, %s4089_s10, %s4090_s11  }
0x1373   : > { %4079 = dma.done.wait (%p3993_p5), [#allocation4], 256  }
0x1374   : > { %4081 = vsyncadd (%p3993_p5), [#allocation4], 4294967040 }
0x1375 PF: > { %s19_s27 = sadd.s32 1, %s4084_s27  }
0x1376   : > { %p16_p4 = scmp.ge.s32.totalorder %s19_s27, 4  }
0x1378   :  { %18 = sbr.rel (!%p16_p4) target bundleno = 1 (0x1), region = 110 }
0x137f   :  { %3257 = vsyncpa [#allocation4], 1 }
0x1380   :  { %3259 = vsyncpa [#allocation4 + $0x1], 1 }

</bundles_post_ra>
